<compile_context>
chip_gen: v7x
topology: tpu7x:2x2x1
jax: 0.10.0
libtpu: 0.0.40
codegen_flags: <defaults>
</compile_context>

<pallas_src>
import jax
import jax.numpy as jnp
from jax.experimental import pallas as pl
from jax.experimental.pallas import tpu as pltpu

NUM_Z = 10      # embedding vocab size
Z_DIM = 8       # embedding dim
N_FEAT = 11     # continuous features (use_pos=False: 19 - 8 = 11)


def _round_up(a: int, m: int) -> int:
    return ((a + m - 1) // m) * m


def reference(x, emb_table, w, b):
    """Pure-JAX reference mirroring the PyTorch forward."""
    z = jnp.round(x[:, 0]).astype(jnp.int32)
    feat = x[:, 1:]
    z_emb = emb_table[z]                                  # embedding lookup
    cat = jnp.concatenate([z_emb, feat], axis=-1)         # [N, 19]
    return cat @ w + b


def qm9_encoder_kernel(x_ref, we_ref, wx_ref, o_ref):
    """x_ref : [TM, C]  f32 (col 0 = atomic index as float, rest = features)
       we_ref: [10, HP] f32 (embedding table folded into projection, + bias)
       wx_ref: [C,  HP] f32 (row 0 zeroed so the z column contributes nothing)
       o_ref : [TM, HP] output dtype
    """
    tm = x_ref.shape[0]
    x = x_ref[...]                                               # [TM, C]
    # z column holds a non-negative near-integer float; +0.5 then truncate
    # == round (avoids the 2.9999997 -> 2 truncation hazard).
    z = (x[:, 0:1] + jnp.float32(0.5)).astype(jnp.int32)         # [TM, 1]
    col = jax.lax.broadcasted_iota(jnp.int32, (tm, NUM_Z), 1)    # [TM, 10]
    onehot = (col == z).astype(jnp.float32)                      # [TM, 10]

    out = (jnp.dot(onehot, we_ref[...], preferred_element_type=jnp.float32)
           + jnp.dot(x, wx_ref[...], preferred_element_type=jnp.float32))
    o_ref[...] = out.astype(o_ref.dtype)


def qm9_input_encoder(x, emb_table, w, b, *, tm=1024,
                      out_dtype=jnp.float32, small_n_xla_fallback=True):
    """x: [N, C] (col 0 = atomic index as float, cols 1.. = features).
    emb_table: [10, 8], w: [8 + (C-1), H], b: [H].  Returns [N, H]."""
    n, c = x.shape
    h = w.shape[1]
    assert w.shape[0] == Z_DIM + (c - 1), (w.shape, c)

    # Tiny graphs: kernel launch + pipeline setup dwarfs the useful traffic.
    if small_n_xla_fallback and n * h * 4 < (1 << 20):
        return reference(x, emb_table, w, b).astype(out_dtype)

    x = x.astype(jnp.float32)
    w = w.astype(jnp.float32)
    b = b.astype(jnp.float32)
    emb_table = emb_table.astype(jnp.float32)

    # --- wrapper-side prep (tiny tensors only) -------------------------------
    # Fold the embedding table AND the bias into the projection: each one-hot
    # row sums to exactly 1 for in-range z, so the bias rides along.
    emb_proj = jnp.dot(emb_table, w[:Z_DIM],
                       preferred_element_type=jnp.float32) + b[None, :]   # [10, H]
    # Weight applied to the raw x block: a zero row kills the z column.
    w_x = jnp.concatenate([jnp.zeros((1, h), jnp.float32), w[Z_DIM:]], 0)  # [C, H]

    # Lane-dense hidden dim: pad H up to a multiple of 128 so stores are full
    # vst (identity when H is already 128-aligned, e.g. hidden=128/256/...).
    hp = _round_up(max(h, 128), 128)
    if hp != h:
        emb_proj = jnp.pad(emb_proj, ((0, 0), (0, hp - h)))
        w_x = jnp.pad(w_x, ((0, 0), (0, hp - h)))

    # Row tile: multiple of 8; NO row padding — Pallas handles the ragged last
    # block (padded reads, dropped out-of-bounds writes).
    tm_eff = max(8, min(_round_up(tm, 8), _round_up(n, 8)))
    grid_rows = pl.cdiv(n, tm_eff)
    # Keep >= 2 grid steps when there's enough work so v7x megacore can shard
    # the parallel axis across its two TensorCores.
    if grid_rows == 1 and n >= 1024:
        tm_eff = max(8, _round_up(pl.cdiv(n, 2), 8))
        grid_rows = pl.cdiv(n, tm_eff)

    # Explicit VMEM budget from the tile (double-buffered input block padded
    # to 128 lanes, double-buffered output block, small resident weights), so
    # a tile tuned on v6e (128 MiB) never silently overshoots v7x (64 MiB).
    tile_bytes = (2 * tm_eff * max(128, _round_up(c, 128)) * 4
                  + 2 * tm_eff * hp * 4
                  + 2 * (NUM_Z + c) * hp * 4)
    vmem_limit = int(min(max(2 * tile_bytes + (4 << 20), 16 << 20), 64 << 20))

    out = pl.pallas_call(
        qm9_encoder_kernel,
        out_shape=jax.ShapeDtypeStruct((n, hp), out_dtype),
        grid=(grid_rows,),
        in_specs=[
            pl.BlockSpec((tm_eff, c), lambda i: (i, 0)),     # raw x rows
            pl.BlockSpec((NUM_Z, hp), lambda i: (0, 0)),     # folded emb proj + bias
            pl.BlockSpec((c, hp), lambda i: (0, 0)),         # feature weights
        ],
        out_specs=pl.BlockSpec((tm_eff, hp), lambda i: (i, 0)),
        compiler_params=pltpu.CompilerParams(
            dimension_semantics=("parallel",),
            vmem_limit_bytes=vmem_limit),
    )(x, emb_proj, w_x)

    # Identity when H is 128-aligned; otherwise a single cheap column slice.
    return out if hp == h else out[:, :h]


if __name__ == "__main__":
    key = jax.random.PRNGKey(0)
    k_f, k_z, k_emb, k_w, k_b = jax.random.split(key, 5)

    N = 3000       # rows (atoms): 3 grid steps of 1024 incl. a ragged tail
    HIDDEN = 128   # hidden_channels (lane-dense output, no column slice)

    # Input: column 0 = integer atomic index in [0, 10), columns 1..11 = feats.
    z_col = jax.random.randint(k_z, (N, 1), 0, NUM_Z).astype(jnp.float32)
    feats = jax.random.normal(k_f, (N, N_FEAT), dtype=jnp.float32)
    x = jnp.concatenate([z_col, feats], axis=-1)          # [N, 12]

    # Synthetic parameters with the module's shapes.
    emb_table = jax.random.normal(k_emb, (NUM_Z, Z_DIM), dtype=jnp.float32)
    w = jax.random.normal(k_w, (Z_DIM + N_FEAT, HIDDEN), dtype=jnp.float32) * 0.1
    b = jax.random.normal(k_b, (HIDDEN,), dtype=jnp.float32) * 0.1

    out = qm9_input_encoder(x, emb_table, w, b, tm=1024)
    out = jax.block_until_ready(out)

    ref = reference(x, emb_table, w, b)
    assert out.shape == (N, HIDDEN), out.shape
    assert jnp.allclose(out, ref, atol=1e-4, rtol=1e-4), "mismatch vs reference"

    print("KERNEL_OK")
</pallas_src>

<mosaic_0001>
module attributes {stable_mosaic.version = 11 : i64} {
  func.func @qm9_encoder_kernel(%arg0: i32, %arg1: memref<1024x12xf32, #tpu.memory_space<vmem>>, %arg2: memref<10x128xf32, #tpu.memory_space<vmem>>, %arg3: memref<12x128xf32, #tpu.memory_space<vmem>>, %arg4: memref<1024x128xf32, #tpu.memory_space<vmem>>) attributes {dimension_semantics = [#tpu.dimension_semantics<parallel>], iteration_bounds = array<i64: 3>, scalar_prefetch = 0 : i64, scratch_operands = 0 : i64, tpu.core_type = #tpu.core_type<tc>, window_params = [{transform_indices = @transform_0, window_bounds = array<i64: 1024, 12>}, {pipeline_mode = #tpu.pipeline_mode<synchronous>, transform_indices = @transform_1, window_bounds = array<i64: 10, 128>}, {pipeline_mode = #tpu.pipeline_mode<synchronous>, transform_indices = @transform_2, window_bounds = array<i64: 12, 128>}, {transform_indices = @transform_3, window_bounds = array<i64: 1024, 128>}]} {
    %c0 = arith.constant 0 : index
    %c0_0 = arith.constant 0 : index
    %0 = vector.load %arg1[%c0, %c0_0] : memref<1024x12xf32, #tpu.memory_space<vmem>>, vector<1024x12xf32>
    %1 = vector.extract_strided_slice %0 {offsets = [0, 0], sizes = [1024, 1], strides = [1, 1]} : vector<1024x12xf32> to vector<1024x1xf32>
    %cst = arith.constant 5.000000e-01 : f32
    %2 = vector.broadcast %cst : f32 to vector<1024x1xf32>
    %3 = arith.addf %1, %2 : vector<1024x1xf32>
    %4 = arith.fptosi %3 : vector<1024x1xf32> to vector<1024x1xi32>
    %5 = tpu.iota {dimensions = array<i32: 1>} : vector<1024x10xi32>
    %6 = vector.broadcast %4 : vector<1024x1xi32> to vector<1024x10xi32>
    %7 = arith.cmpi eq, %5, %6 : vector<1024x10xi32>
    %8 = arith.extui %7 : vector<1024x10xi1> to vector<1024x10xi32>
    %9 = arith.sitofp %8 : vector<1024x10xi32> to vector<1024x10xf32>
    %c0_1 = arith.constant 0 : index
    %c0_2 = arith.constant 0 : index
    %10 = vector.load %arg2[%c0_1, %c0_2] : memref<10x128xf32, #tpu.memory_space<vmem>>, vector<10x128xf32>
    %cst_3 = arith.constant dense<0.000000e+00> : vector<1024x128xf32>
    %11 = tpu.matmul %9, %10, %cst_3 {dimension_numbers = #tpu.dot_dimension_numbers<[1], [0], [0], [1], [0, 0, 1, 1], [], []>} : vector<1024x10xf32>, vector<10x128xf32>, vector<1024x128xf32> -> vector<1024x128xf32>
    %c0_4 = arith.constant 0 : index
    %c0_5 = arith.constant 0 : index
    %12 = vector.load %arg3[%c0_4, %c0_5] : memref<12x128xf32, #tpu.memory_space<vmem>>, vector<12x128xf32>
    %cst_6 = arith.constant dense<0.000000e+00> : vector<1024x128xf32>
    %13 = tpu.matmul %0, %12, %cst_6 {dimension_numbers = #tpu.dot_dimension_numbers<[1], [0], [0], [1], [0, 0, 1, 1], [], []>} : vector<1024x12xf32>, vector<12x128xf32>, vector<1024x128xf32> -> vector<1024x128xf32>
    %14 = arith.addf %11, %13 : vector<1024x128xf32>
    %c0_7 = arith.constant 0 : index
    %c0_8 = arith.constant 0 : index
    %15 = vector.load %arg4[%c0_7, %c0_8] : memref<1024x128xf32, #tpu.memory_space<vmem>>, vector<1024x128xf32>
    tpu.vector_store %arg4[%c0_7, %c0_8], %14 {strides = array<i32>} : memref<1024x128xf32, #tpu.memory_space<vmem>>, vector<1024x128xf32>,
    return
  }
  func.func @transform_0(%arg0: i32) -> (i32, i32) {
    %c0_i32 = arith.constant 0 : i32
    %c0_i32_0 = arith.constant 0 : i32
    return %arg0, %c0_i32 : i32, i32
  }
  func.func @transform_1(%arg0: i32) -> (i32, i32) {
    %c0_i32 = arith.constant 0 : i32
    %c0_i32_0 = arith.constant 0 : i32
    %c0_i32_1 = arith.constant 0 : i32
    return %c0_i32, %c0_i32_0 : i32, i32
  }
  func.func @transform_2(%arg0: i32) -> (i32, i32) {
    %c0_i32 = arith.constant 0 : i32
    %c0_i32_0 = arith.constant 0 : i32
    %c0_i32_1 = arith.constant 0 : i32
    return %c0_i32, %c0_i32_0 : i32, i32
  }
  func.func @transform_3(%arg0: i32) -> (i32, i32) {
    %c0_i32 = arith.constant 0 : i32
    %c0_i32_0 = arith.constant 0 : i32
    return %arg0, %c0_i32 : i32, i32
  }
}

</mosaic_0001>

<bundles_post_ra>
// kernel: tpu_custom_call.1
= control target key start
LH: loop header
LB: loop body
LE: loop exit
PB: predicated region body
PF: predicated region fallthrough
CT: control target
= control target key end

     0   :  { %8 = vsyncpa [#allocation3], 0  ;;  %s7196_s0 = inlined_call_operand.vmem [shape: f32[3000,12], index: 0, kind: input, shape index: {}]   ;;  %s7197_s1 = inlined_call_operand.vmem [shape: f32[10,128], index: 1, kind: input, shape index: {}]   ;;  %s7198_s2 = inlined_call_operand.vmem [shape: f32[12,128], index: 2, kind: input, shape index: {}]   ;;  %s7199_s3 = inlined_call_operand.hbm [shape: f32[3000,128], index: 3, kind: output, shape index: {}]  }
   0x1   :  { %10 = vsyncpa [#allocation3 + $0x1], 0  ;;  %s5338_s12 = smov 0   ;;  %s5340_s13 = smov 0  }
   0x2   :  { %s5342_s14 = smov 0   ;;  %s5344_s15 = smov 0  }
   0x3 LB: > { %s5359_s16 = sadd.s32 4294967295, %s5310_s15   ;;  %s3752_s17 = sadd.s32 4294967294, %s5310_s15   ;;  %s5310_s15 = sphi %s5344_s15, %s7205_s15   ;;  %s5306_s14 = sphi %s5342_s14, %s7204_s14   ;;  %s5302_s13 = sphi %s5340_s13, %s7203_s13   ;;  %s5298_s12 = sphi %s5338_s12, %s7202_s12  }
   0x4   : > { %s5363_s18 = sadd.s32 1, %s5310_s15   ;;  %s91_s19 = sadd.s32 1, %s5306_s14 }
   0x5   : > { %s88_s20 = ssub.s32 %s5310_s15, %s5363_s18  ;;  %p101_p0 = scmp.ne.s32.totalorder %s5306_s14, %s5302_s13 }
   0x6   : > { %p89_p1 = scmp.eq.s32.totalorder %s88_s20, 0  ;;  %p102_p2 = scmp.eq.s32.totalorder %s5359_s16, 2 }
   0x7   : > { %p107_p3 = scmp.ne.s32.totalorder %s5302_s13, %s5298_s12  ;;  %p108_p4 = scmp.eq.s32.totalorder %s3752_s17, 2 }
   0x8   : > { %s5374_s21 = scalar_select %p89_p1, %s5306_s14, %s91_s19  }
   0x9   : > { %p5376_p5 = por %p102_p2, %p101_p0  ;;  %p5380_p6 = por %p108_p4, %p107_p3 }
   0xa   : > { %p3755_p7 = scmp.ge.s32.totalorder %s5310_s15, 1  ;;  %p149_p8 = scmp.lt.s32.totalorder %s5310_s15, 4 }
   0xc   : > { %p150_p9 = pnand %p3755_p7, %p149_p8 }
   0xd   : > { %s5387_s24 = sshll.u32 (!%p150_p9), %s5359_s16, 7  ;;  %v5312_v0 = vmov (!%p150_p9), 0   ;;  %vm1739_vm0 = vcmask (!%p150_p9), 1043456   ;;  %vm2833_vm1 = vcmask (!%p150_p9), 1041408   ;;  %vm5313_vm2 = vmmov (!%p150_p9), 1   ;;  %s174_s11 = sand.u32 (!%p150_p9), 1, %s5302_s13  }
   0xe   : > { %153 = sbr.rel (%p150_p9) target bundleno = 662 (0x296), region = 32  ;;  %5247 = vset.pattern.permute.xlu1 (!%p150_p9), %v5312_v0  ;;  %5246 = vset.pattern.permute.xlu0 (!%p150_p9), %v5312_v0  ;;  %p182_p10 = scmp.lt.s32.totalorder (!%p150_p9), %s5387_s24, 374  ;;  %vm4808_vm3 = vmpackc.low (!%p150_p9), %vm1739_vm0, %vm5313_vm2  ;;  %vm1354_vm5 = vcmask (!%p150_p9), 97280   ;;  %vm2448_vm6 = vcmask (!%p150_p9), 80896  }
   0xf   : > { %vm4814_vm4 = vmpackc.low (!%p150_p9), %vm2833_vm1, %vm5313_vm2  ;;  %s3756_s17 = sshll.u32 (!%p150_p9), %s174_s11, 10  ;;  %s7135_s20 = scalar_lea.sflag (!%p150_p9), [#allocation3], %s174_s11 }
  0x10   : > { %s6653_s19 = scalar_lea.vmem (!%p150_p9), [#allocation2], %s3756_s17 }
  0x15   : > { %s183_s25 = scalar_select %p182_p10, %s5387_s24, 374 }
  0x17   : > { %s3758_s26 = sshll.u32 %s183_s25, 3  ;;  %s3679_s25 = ssub.s32 (%p5376_p5), 375, %s5387_s24 }
  0x18   : > { %s5394_s29 = scalar_lea.vmem %s7196_s0, %s3758_s26  ;;  %p3680_p11 = scmp.lt.s32.totalorder (%p5376_p5), %s3679_s25, 128 }
  0x19   : > { %v5397_v1 = vld [vmem:[%s5394_s29 + $0x10] sm:$0xff]  ;;  %v5400_v2 = vld [vmem:[%s5394_s29] sm:$0xff]  ;;  %v5403_v3 = vld [vmem:[%s5394_s29 + $0x18] sm:$0xff] }
  0x1a   : > { %v326_v4 = vadd.f32 0.5, %v5397_v1  ;;  %v324_v5 = vadd.f32 0.5, %v5400_v2  ;;  %v327_v6 = vadd.f32 0.5, %v5403_v3  ;;  %v5409_v7 = vld [vmem:[%s5394_s29 + $0x8] sm:$0xff]  ;;  %v5415_v9 = vld [vmem:[%s5394_s29 + $0x20] sm:$0xff]  ;;  %v5421_v16 = vld [vmem:[%s5394_s29 + $0x38] sm:$0xff]  ;;  %4419 = vmatprep.mubr.msk.f32.mxu1 %vm1354_vm5, %v5400_v2 }
  0x1b   : > { %v5412_v8 = vld [vmem:[%s5394_s29 + $0x28] sm:$0xff]  ;;  %v325_v10 = vadd.f32 0.5, %v5409_v7  ;;  %v328_v15 = vadd.f32 0.5, %v5415_v9  ;;  %v5424_v18 = vld [vmem:[%s5394_s29 + $0x30] sm:$0xff]  ;;  %v331_v22 = vadd.f32 0.5, %v5421_v16  ;;  %v5432_v28 = vld [vmem:[%s5394_s29 + $0x40] sm:$0xff] }
  0x1c   : > { %v329_v11 = vadd.f32 0.5, %v5412_v8  ;;  %v4951_v12 = vtrunc.f32 %v326_v4  ;;  %v4947_v13 = vtrunc.f32 %v324_v5  ;;  %v4953_v14 = vtrunc.f32 %v327_v6  ;;  %v5429_v27 = vld [vmem:[%s5394_s29 + $0x48] sm:$0xff]  ;;  %v5437_v35 = vld [vmem:[%s5394_s29 + $0x58] sm:$0xff]  ;;  %v5440_v36 = vld [vmem:[%s5394_s29 + $0x50] sm:$0xff] }
  0x1d   : > { %v4949_v17 = vtrunc.f32 %v325_v10  ;;  %v4955_v25 = vtrunc.f32 %v328_v15  ;;  %v330_v26 = vadd.f32 0.5, %v5424_v18  ;;  %v4961_v30 = vtrunc.f32 %v331_v22  ;;  %v5445_v43 = vld [vmem:[%s5394_s29 + $0x68] sm:$0xff]  ;;  %v5448_v44 = vld [vmem:[%s5394_s29 + $0x60] sm:$0xff]  ;;  %v5453_v51 = vld [vmem:[%s5394_s29 + $0x78] sm:$0xff] }
  0x1e   : > { %v4952_v19 = vcvt.f32.s32 %v4951_v12  ;;  %v4948_v20 = vcvt.f32.s32 %v4947_v13  ;;  %v4957_v21 = vtrunc.f32 %v329_v11  ;;  %v4954_v23 = vcvt.f32.s32 %v4953_v14  ;;  %v5456_v52 = vld [vmem:[%s5394_s29 + $0x70] sm:$0xff]  ;;  %v5461_v59 = vld [vmem:[%s5394_s29 + $0x88] sm:$0xff]  ;;  %v5464_v60 = vld [vmem:[%s5394_s29 + $0x80] sm:$0xff] }
  0x1f   : > { %v4950_v24 = vcvt.f32.s32 %v4949_v17  ;;  %v4956_v31 = vcvt.f32.s32 %v4955_v25  ;;  %v4959_v32 = vtrunc.f32 %v330_v26  ;;  %v333_v33 = vadd.f32 0.5, %v5429_v27  ;;  %v5469_v6 = vld [vmem:[%s5394_s29 + $0x98] sm:$0xff]  ;;  %v5472_v10 = vld [vmem:[%s5394_s29 + $0x90] sm:$0xff] }
  0x20   : > { %589 = vperm.xlu1 %5247, %v4952_v19   ;;  %583 = vperm.xlu0 %5246, %v4948_v20   ;;  %v4958_v29 = vcvt.f32.s32 %v4957_v21  ;;  %v332_v34 = vadd.f32 0.5, %v5432_v28  ;;  %v4962_v37 = vcvt.f32.s32 %v4961_v30  ;;  %v335_v38 = vadd.f32 0.5, %v5437_v35  ;;  %v5477_v19 = vld [vmem:[%s5394_s29 + $0xa8] sm:$0xff]  ;;  %v5480_v20 = vld [vmem:[%s5394_s29 + $0xa0] sm:$0xff]  ;;  %v5488_v30 = vld [vmem:[%s5394_s29 + $0xb0] sm:$0xff] }
  0x21   : > { %v4960_v39 = vcvt.f32.s32 %v4959_v32  ;;  %v4965_v40 = vtrunc.f32 %v333_v33  ;;  %v334_v42 = vadd.f32 0.5, %v5440_v36  ;;  %v337_v45 = vadd.f32 0.5, %v5445_v43  ;;  %v5554_v2 = vld [vmem:[%s5394_s29 + $0x110] sm:$0xff] }
  0x22   : > { %v4963_v41 = vtrunc.f32 %v332_v34  ;;  %v336_v46 = vadd.f32 0.5, %v5448_v44  ;;  %v4969_v49 = vtrunc.f32 %v335_v38  ;;  %v339_v54 = vadd.f32 0.5, %v5453_v51 }
  0x23   : > { %v4966_v47 = vcvt.f32.s32 %v4965_v40  ;;  %v4967_v50 = vtrunc.f32 %v334_v42  ;;  %v4973_v53 = vtrunc.f32 %v337_v45  ;;  %v338_v58 = vadd.f32 0.5, %v5456_v52  ;;  %v5496_v40 = vld [vmem:[%s5394_s29 + $0xc0] sm:$0xff] }
  0x24   : > { %592 = vperm.xlu1 %5247, %v4954_v23   ;;  %586 = vperm.xlu0 %5246, %v4950_v24   ;;  %v4964_v48 = vcvt.f32.s32 %v4963_v41  ;;  %v4970_v55 = vcvt.f32.s32 %v4969_v49  ;;  %v4971_v57 = vtrunc.f32 %v336_v46  ;;  %v4977_v62 = vtrunc.f32 %v339_v54  ;;  %v5501_v49 = vld [vmem:[%s5394_s29 + $0xd8] sm:$0xff] }
  0x25   : > { %v4968_v56 = vcvt.f32.s32 %v4967_v50  ;;  %v4974_v61 = vcvt.f32.s32 %v4973_v53  ;;  %v4975_v0 = vtrunc.f32 %v338_v58  ;;  %v341_v4 = vadd.f32 0.5, %v5461_v59  ;;  %v5504_v50 = vld [vmem:[%s5394_s29 + $0xd0] sm:$0xff] }
  0x26   : > { %v4972_v63 = vcvt.f32.s32 %v4971_v57  ;;  %v340_v5 = vadd.f32 0.5, %v5464_v60  ;;  %v4978_v11 = vcvt.f32.s32 %v4977_v62  ;;  %v343_v12 = vadd.f32 0.5, %v5469_v6 }
  0x27   : > { %v4976_v13 = vcvt.f32.s32 %v4975_v0  ;;  %v4981_v14 = vtrunc.f32 %v341_v4  ;;  %v342_v17 = vadd.f32 0.5, %v5472_v10  ;;  %v345_v21 = vadd.f32 0.5, %v5477_v19  ;;  %v1353_v0 = vld [vmem:[%s7198_s2 + $0x8] sm:$0xf] }
  0x28   : > { %598 = vperm.xlu1 %5247, %v4958_v29   ;;  %595 = vperm.xlu0 %5246, %v4956_v31   ;;  %v4979_v15 = vtrunc.f32 %v340_v5  ;;  %v344_v22 = vadd.f32 0.5, %v5480_v20  ;;  %v4985_v25 = vtrunc.f32 %v343_v12  ;;  %v5485_v29 = vld [vmem:[%s5394_s29 + $0xb8] sm:$0xff]  ;;  %v346_v38 = vadd.f32 0.5, %v5488_v30  ;;  %v1351_v12 = vld [vmem:[%s7197_s1 + $0x8] sm:$0x3] }
  0x29   : > { %v4982_v23 = vcvt.f32.s32 %v4981_v14  ;;  %v4983_v26 = vtrunc.f32 %v342_v17  ;;  %v4989_v31 = vtrunc.f32 %v345_v21  ;;  %v347_v32 = vadd.f32 0.5, %v5485_v29 }
  0x2a   : > { %v4980_v24 = vcvt.f32.s32 %v4979_v15  ;;  %v4986_v33 = vcvt.f32.s32 %v4985_v25  ;;  %v4991_v46 = vtrunc.f32 %v346_v38  ;;  %v351_v53 = vadd.f32 0.5, %v5501_v49  ;;  %v5540_v38 = vld [vmem:[%s5394_s29 + $0x100] sm:$0xff] }
  0x2b   : > { %v4984_v34 = vcvt.f32.s32 %v4983_v26  ;;  %v4990_v41 = vcvt.f32.s32 %v4989_v31  ;;  %v4993_v42 = vtrunc.f32 %v347_v32  ;;  %v350_v54 = vadd.f32 0.5, %v5504_v50 }
  0x2c   : > { %604 = vperm.xlu1 %5247, %v4962_v37   ;;  %601 = vperm.xlu0 %5246, %v4960_v39   ;;  %v4987_v37 = vtrunc.f32 %v344_v22  ;;  %v5493_v39 = vld [vmem:[%s5394_s29 + $0xc8] sm:$0xff]  ;;  %v4992_v58 = vcvt.f32.s32 %v4991_v46  ;;  %v5529_v22 = vld [vmem:[%s5394_s29 + $0xf8] sm:$0xff] }
  0x2d   : > { %v4994_v57 = vcvt.f32.s32 %v4993_v42  ;;  %v4999_v14 = vtrunc.f32 %v350_v54  ;;  %v355_v26 = vadd.f32 0.5, %v5529_v22 }
  0x2e   : > { %v4988_v45 = vcvt.f32.s32 %v4987_v37  ;;  %v5537_v37 = vld [vmem:[%s5394_s29 + $0x108] sm:$0xff] }
  0x2f   : > { %v5000_v32 = vcvt.f32.s32 %v4999_v14  ;;  %v5009_v42 = vtrunc.f32 %v355_v26 }
  0x30   : > { %610 = vperm.xlu1 %5247, %v4966_v47   ;;  %607 = vperm.xlu0 %5246, %v4964_v48   ;;  %v349_v47 = vadd.f32 0.5, %v5493_v39  ;;  %v348_v48 = vadd.f32 0.5, %v5496_v40 }
  0x32   : > { %v4995_v62 = vtrunc.f32 %v348_v48  ;;  %v356_v48 = vadd.f32 0.5, %v5540_v38 }
  0x34   : > { %616 = vperm.xlu1 %5247, %v4970_v55   ;;  %613 = vperm.xlu0 %5246, %v4968_v56   ;;  %v5509_v55 = vld [vmem:[%s5394_s29 + $0xe8] sm:$0xff]  ;;  %v5512_v56 = vld [vmem:[%s5394_s29 + $0xe0] sm:$0xff]  ;;  %v4996_v21 = vcvt.f32.s32 %v4995_v62 }
  0x35   : > { %v353_v4 = vadd.f32 0.5, %v5509_v55  ;;  %v352_v5 = vadd.f32 0.5, %v5512_v56  ;;  %v5563_v62 = vld [vmem:[%s5394_s29 + $0x128] sm:$0xff] }
  0x37   : > { %v5005_v25 = vtrunc.f32 %v353_v4 }
  0x38   : > { %622 = vperm.xlu1 %5247, %v4974_v61   ;;  %619 = vperm.xlu0 %5246, %v4972_v63   ;;  %v4997_v61 = vtrunc.f32 %v349_v47  ;;  %v1352_v63 = vld [vmem:[%s7198_s2] sm:$0xff]  ;;  %v357_v47 = vadd.f32 0.5, %v5537_v37 }
  0x39   : > { %v4807_v15 = vpack.c.bf16 %v1353_v0, %v1352_v63  ;;  %v5566_v63 = vld [vmem:[%s5394_s29 + $0x120] sm:$0xff] }
  0x3a   : > { %v4998_v17 = vcvt.f32.s32 %v4997_v61  ;;  %v358_v61 = vadd.f32 0.5, %v5554_v2 }
  0x3b   : > { %4809 = vmatprep.subr.msk.bf16.mxu1 %vm4808_vm3, %v4807_v15 }
  0x3c   : > { %628 = vperm.xlu1 %5247, %v4978_v11   ;;  %625 = vperm.xlu0 %5246, %v4976_v13   ;;  %v1350_v11 = vld [vmem:[%s7197_s1] sm:$0xff]  ;;  %v5001_v13 = vtrunc.f32 %v351_v53  ;;  %v5551_v53 = vld [vmem:[%s5394_s29 + $0x118] sm:$0xff] }
  0x3d   : > { %4812 = vmatpush3.bf16.msk.msra.mxu1 %vm4808_vm3, %v4807_v15 }
  0x3e   : > { %v5002_v31 = vcvt.f32.s32 %v5001_v13  ;;  %v5578_v13 = vld [vmem:[%s5394_s29 + $0x130] sm:$0xff] }
  0x40   : > { %634 = vperm.xlu1 %5247, %v4982_v23   ;;  %631 = vperm.xlu0 %5246, %v4980_v24   ;;  %v5532_v23 = vld [vmem:[%s5394_s29 + $0xf0] sm:$0xff]  ;;  %v4813_v24 = vpack.c.bf16 %v1351_v12, %v1350_v11  ;;  %v5015_v11 = vtrunc.f32 %v358_v61  ;;  %v5575_v12 = vld [vmem:[%s5394_s29 + $0x138] sm:$0xff] }
  0x41   : > { %4420 = vmatmul.mubr.msk.f32.vlgmr.msra.gmra.mrb[0].mxu1 %vm1354_vm5, %v5409_v7  ;;  %v5010_v7 = vcvt.f32.s32 %v5009_v42  ;;  %v363_v14 = vadd.f32 0.5, %v5575_v12  ;;  %v5623_v61 = vld [vmem:[%s5394_s29 + $0x178] sm:$0xff] }
  0x42   : > { %4815 = vmatprep.subr.msk.bf16.mxu0 %vm4814_vm4, %v4813_v24  ;;  %4422 = vmatprep.mubr.msk.f32.mxu1 %vm1354_vm5, %v5397_v1  ;;  %v359_v1 = vadd.f32 0.5, %v5551_v53  ;;  %v5016_v15 = vcvt.f32.s32 %v5015_v11  ;;  %v5635_v11 = vld [vmem:[%s5394_s29 + $0x188] sm:$0xff] }
  0x43   : > { %4818 = vmatpush3.bf16.msk.msra.mxu0 %vm4814_vm4, %v4813_v24  ;;  %v5587_v24 = vld [vmem:[%s5394_s29 + $0x148] sm:$0xff]  ;;  %v5025_v26 = vtrunc.f32 %v363_v14 }
  0x44   : > { %640 = vperm.xlu1 %5247, %v4986_v33   ;;  %637 = vperm.xlu0 %5246, %v4984_v34   ;;  %v5003_v33 = vtrunc.f32 %v352_v5  ;;  %v354_v34 = vadd.f32 0.5, %v5532_v23  ;;  %v5017_v5 = vtrunc.f32 %v359_v1 }
  0x45   : > { %4423 = vmatmul.mubr.msk.f32.gmra.mrb[2].mxu1 %vm1354_vm5, %v5403_v3  ;;  %v361_v3 = vadd.f32 0.5, %v5563_v62 }
  0x46   : > { %v5007_v46 = vtrunc.f32 %v354_v34  ;;  %4425 = vmatprep.mubr.msk.f32.mxu1 %vm1354_vm5, %v5415_v9  ;;  %v360_v9 = vadd.f32 0.5, %v5566_v63  ;;  %v5599_v34 = vld [vmem:[%s5394_s29 + $0x158] sm:$0xff] }
  0x48   : > { %646 = vperm.xlu1 %5247, %v4990_v41   ;;  %643 = vperm.xlu0 %5246, %v4988_v45   ;;  %v5006_v41 = vcvt.f32.s32 %v5005_v25  ;;  %v5004_v45 = vcvt.f32.s32 %v5003_v33  ;;  %v5008_v54 = vcvt.f32.s32 %v5007_v46  ;;  %v5590_v25 = vld [vmem:[%s5394_s29 + $0x140] sm:$0xff] }
  0x49   : > { %4426 = vmatmul.mubr.msk.f32.gmra.mrb[4].mxu1 %vm1354_vm5, %v5412_v8  ;;  %v5021_v8 = vtrunc.f32 %v361_v3  ;;  %v364_v33 = vadd.f32 0.5, %v5590_v25  ;;  %v5626_v3 = vld [vmem:[%s5394_s29 + $0x170] sm:$0xff] }
  0x4a   : > { %4428 = vmatprep.mubr.msk.f32.mxu1 %vm1354_vm5, %v5424_v18  ;;  %v5018_v18 = vcvt.f32.s32 %v5017_v5  ;;  %v370_v5 = vadd.f32 0.5, %v5626_v3 }
  0x4b   : > { %v5027_v46 = vtrunc.f32 %v364_v33  ;;  %v5659_v33 = vld [vmem:[%s5394_s29 + $0x1a8] sm:$0xff] }
  0x4c   : > { %652 = vperm.xlu1 %5247, %v4994_v57   ;;  %649 = vperm.xlu0 %5246, %v4992_v58   ;;  %v5013_v57 = vtrunc.f32 %v357_v47  ;;  %v5011_v58 = vtrunc.f32 %v356_v48  ;;  %v5611_v48 = vld [vmem:[%s5394_s29 + $0x168] sm:$0xff] }
  0x4d   : > { %4429 = vmatmul.mubr.msk.f32.gmra.mrb[6].mxu1 %vm1354_vm5, %v5421_v16  ;;  %v5022_v16 = vcvt.f32.s32 %v5021_v8  ;;  %v5638_v8 = vld [vmem:[%s5394_s29 + $0x180] sm:$0xff] }
  0x4e   : > { %v5014_v0 = vcvt.f32.s32 %v5013_v57  ;;  %v5012_v4 = vcvt.f32.s32 %v5011_v58  ;;  %4431 = vmatprep.mubr.msk.f32.mxu1 %vm1354_vm5, %v5432_v28 }
  0x50   : > { %658 = vperm.xlu1 %5247, %v4998_v17   ;;  %655 = vperm.xlu0 %5246, %v4996_v21   ;;  %v5019_v17 = vtrunc.f32 %v360_v9  ;;  %v362_v21 = vadd.f32 0.5, %v5578_v13  ;;  %v371_v9 = vadd.f32 0.5, %v5623_v61 }
  0x51   : > { %4432 = vmatmul.mubr.msk.f32.gmra.mrb[8].mxu1 %vm1354_vm5, %v5429_v27  ;;  %v5026_v27 = vcvt.f32.s32 %v5025_v26 }
  0x52   : > { %4434 = vmatprep.mubr.msk.f32.mxu1 %vm1354_vm5, %v5440_v36  ;;  %v5020_v28 = vcvt.f32.s32 %v5019_v17  ;;  %v367_v36 = vadd.f32 0.5, %v5599_v34  ;;  %v5041_v14 = vtrunc.f32 %v371_v9  ;;  %v372_v17 = vadd.f32 0.5, %v5638_v8 }
  0x54   : > { %664 = vperm.xlu1 %5247, %v5002_v31   ;;  %661 = vperm.xlu0 %5246, %v5000_v32   ;;  %v5023_v31 = vtrunc.f32 %v362_v21  ;;  %v365_v32 = vadd.f32 0.5, %v5587_v24  ;;  %v5033_v57 = vtrunc.f32 %v367_v36  ;;  %v5647_v21 = vld [vmem:[%s5394_s29 + $0x198] sm:$0xff] }
  0x55   : > { %4435 = vmatmul.mubr.msk.f32.gmra.mrb[10].mxu1 %vm1354_vm5, %v5437_v35  ;;  %v369_v35 = vadd.f32 0.5, %v5611_v48 }
  0x56   : > { %4437 = vmatprep.mubr.msk.f32.mxu1 %vm1354_vm5, %v5448_v44  ;;  %v5024_v42 = vcvt.f32.s32 %v5023_v31  ;;  %v5043_v31 = vtrunc.f32 %v372_v17  ;;  %v5707_v17 = vld [vmem:[%s5394_s29 + $0x1e8] sm:$0xff] }
  0x58   : > { %670 = vperm.xlu1 %5247, %v5006_v41   ;;  %667 = vperm.xlu0 %5246, %v5004_v45   ;;  %v5602_v41 = vld [vmem:[%s5394_s29 + $0x150] sm:$0xff]  ;;  %v5029_v45 = vtrunc.f32 %v365_v32 }
  0x59   : > { %v366_v47 = vadd.f32 0.5, %v5602_v41  ;;  %4438 = vmatmul.mubr.msk.f32.gmra.mrb[12].mxu1 %vm1354_vm5, %v5445_v43  ;;  %v5037_v43 = vtrunc.f32 %v369_v35  ;;  %v5674_v35 = vld [vmem:[%s5394_s29 + $0x1b0] sm:$0xff] }
  0x5a   : > { %4440 = vmatprep.mubr.msk.f32.mxu1 %vm1354_vm5, %v5456_v52  ;;  %v5030_v1 = vcvt.f32.s32 %v5029_v45  ;;  %v5034_v52 = vcvt.f32.s32 %v5033_v57  ;;  %v378_v57 = vadd.f32 0.5, %v5674_v35 }
  0x5b   : > { %v5031_v58 = vtrunc.f32 %v366_v47  ;;  %v5671_v47 = vld [vmem:[%s5394_s29 + $0x1b8] sm:$0xff] }
  0x5c   : > { %676 = vperm.xlu1 %5247, %v5010_v7   ;;  %673 = vperm.xlu0 %5246, %v5008_v54   ;;  %v5614_v7 = vld [vmem:[%s5394_s29 + $0x160] sm:$0xff]  ;;  %v5028_v54 = vcvt.f32.s32 %v5027_v46 }
  0x5d   : > { %v368_v44 = vadd.f32 0.5, %v5614_v7  ;;  %4441 = vmatmul.mubr.msk.f32.gmra.mrb[14].mxu1 %vm1354_vm5, %v5453_v51  ;;  %v5038_v51 = vcvt.f32.s32 %v5037_v43  ;;  %v5686_v43 = vld [vmem:[%s5394_s29 + $0x1c0] sm:$0xff] }
  0x5e   : > { %4443 = vmatprep.mubr.msk.f32.mxu1 %vm1354_vm5, %v5464_v60 }
  0x60   : > { %682 = vperm.xlu1 %5247, %v5014_v0   ;;  %679 = vperm.xlu0 %5246, %v5012_v4   ;;  %v5032_v0 = vcvt.f32.s32 %v5031_v58  ;;  %v5035_v4 = vtrunc.f32 %v368_v44  ;;  %v379_v44 = vadd.f32 0.5, %v5671_v47  ;;  %v5683_v58 = vld [vmem:[%s5394_s29 + $0x1c8] sm:$0xff] }
  0x61   : > { %4444 = vmatmul.mubr.msk.f32.gmra.mrb[16].mxu1 %vm1354_vm5, %v5461_v59  ;;  %v5042_v59 = vcvt.f32.s32 %v5041_v14 }
  0x62   : > { %4446 = vmatprep.mubr.msk.f32.mxu1 %vm1354_vm5, %v5472_v10  ;;  %v5036_v60 = vcvt.f32.s32 %v5035_v4  ;;  %v375_v10 = vadd.f32 0.5, %v5647_v21  ;;  %v5057_v9 = vtrunc.f32 %v379_v44  ;;  %v380_v4 = vadd.f32 0.5, %v5686_v43 }
  0x64   : > { %688 = vperm.xlu1 %5247, %v5018_v18   ;;  %685 = vperm.xlu0 %5246, %v5016_v15   ;;  %v5039_v18 = vtrunc.f32 %v370_v5  ;;  %v373_v15 = vadd.f32 0.5, %v5635_v11  ;;  %v5049_v45 = vtrunc.f32 %v375_v10  ;;  %v5695_v5 = vld [vmem:[%s5394_s29 + $0x1d8] sm:$0xff] }
  0x65   : > { %4447 = vmatmul.mubr.msk.f32.gmra.mrb[18].mxu1 %vm1354_vm5, %v5469_v6  ;;  %v377_v6 = vadd.f32 0.5, %v5659_v33 }
  0x66   : > { %4449 = vmatprep.mubr.msk.f32.mxu1 %vm1354_vm5, %v5480_v20  ;;  %v5040_v26 = vcvt.f32.s32 %v5039_v18  ;;  %v5059_v18 = vtrunc.f32 %v380_v4 }
  0x68   : > { %694 = vperm.xlu1 %5247, %v5022_v16   ;;  %691 = vperm.xlu0 %5246, %v5020_v28   ;;  %v5650_v16 = vld [vmem:[%s5394_s29 + $0x190] sm:$0xff]  ;;  %v5045_v28 = vtrunc.f32 %v373_v15 }
  0x69   : > { %v374_v32 = vadd.f32 0.5, %v5650_v16  ;;  %4450 = vmatmul.mubr.msk.f32.gmra.mrb[20].mxu1 %vm1354_vm5, %v5477_v19  ;;  %v5053_v19 = vtrunc.f32 %v377_v6  ;;  %v5722_v6 = vld [vmem:[%s5394_s29 + $0x1f0] sm:$0xff] }
  0x6a   : > { %4452 = vmatprep.mubr.msk.f32.mxu1 %vm1354_vm5, %v5488_v30  ;;  %v5046_v36 = vcvt.f32.s32 %v5045_v28  ;;  %v5050_v30 = vcvt.f32.s32 %v5049_v45  ;;  %v386_v45 = vadd.f32 0.5, %v5722_v6 }
  0x6b   : > { %v5047_v46 = vtrunc.f32 %v374_v32  ;;  %v5719_v32 = vld [vmem:[%s5394_s29 + $0x1f8] sm:$0xff] }
  0x6c   : > { %700 = vperm.xlu1 %5247, %v5026_v27   ;;  %697 = vperm.xlu0 %5246, %v5024_v42   ;;  %v5662_v27 = vld [vmem:[%s5394_s29 + $0x1a0] sm:$0xff]  ;;  %v5044_v42 = vcvt.f32.s32 %v5043_v31 }
  0x6d   : > { %v376_v20 = vadd.f32 0.5, %v5662_v27  ;;  %4453 = vmatmul.mubr.msk.f32.gmra.mrb[22].mxu1 %vm1354_vm5, %v5485_v29  ;;  %v5054_v29 = vcvt.f32.s32 %v5053_v19  ;;  %v5734_v19 = vld [vmem:[%s5394_s29 + $0x200] sm:$0xff] }
  0x6e   : > { %4455 = vmatprep.mubr.msk.f32.mxu1 %vm1354_vm5, %v5496_v40 }
  0x70   : > { %706 = vperm.xlu1 %5247, %v5030_v1   ;;  %703 = vperm.xlu0 %5246, %v5028_v54   ;;  %v5048_v1 = vcvt.f32.s32 %v5047_v46  ;;  %v5051_v54 = vtrunc.f32 %v376_v20  ;;  %v387_v20 = vadd.f32 0.5, %v5719_v32  ;;  %v5731_v46 = vld [vmem:[%s5394_s29 + $0x208] sm:$0xff] }
  0x71   : > { %4456 = vmatmul.mubr.msk.f32.gmra.mrb[24].mxu1 %vm1354_vm5, %v5493_v39  ;;  %v5058_v39 = vcvt.f32.s32 %v5057_v9  ;;  %v389_v44 = vadd.f32 0.5, %v5731_v46  ;;  %v580_v9 = vlaneseq }
  0x72   : > { %4458 = vmatprep.mubr.msk.f32.mxu1 %vm1354_vm5, %v5504_v50  ;;  %v5052_v40 = vcvt.f32.s32 %v5051_v54  ;;  %v383_v50 = vadd.f32 0.5, %v5695_v5  ;;  %v388_v54 = vadd.f32 0.5, %v5734_v19 }
  0x74   : > { %712 = vperm.xlu1 %5247, %v5034_v52   ;;  %709 = vperm.xlu0 %5246, %v5032_v0   ;;  %v5055_v52 = vtrunc.f32 %v378_v57  ;;  %v381_v0 = vadd.f32 0.5, %v5683_v58  ;;  %v5065_v28 = vtrunc.f32 %v383_v50  ;;  %v5743_v57 = vld [vmem:[%s5394_s29 + $0x218] sm:$0xff]  ;;  %v5758_v50 = vld [vmem:[%s5394_s29 + $0x220] sm:$0xff] }
  0x75   : > { %4459 = vmatmul.mubr.msk.f32.gmra.mrb[26].mxu1 %vm1354_vm5, %v5501_v49  ;;  %v385_v49 = vadd.f32 0.5, %v5707_v17 }
  0x76   : > { %4461 = vmatprep.mubr.msk.f32.mxu1 %vm1354_vm5, %v5512_v56  ;;  %v5056_v14 = vcvt.f32.s32 %v5055_v52  ;;  %v5075_v52 = vtrunc.f32 %v388_v54 }
  0x78   : > { %718 = vperm.xlu1 %5247, %v5038_v51   ;;  %715 = vperm.xlu0 %5246, %v5036_v60   ;;  %v5698_v51 = vld [vmem:[%s5394_s29 + $0x1d0] sm:$0xff]  ;;  %v5061_v60 = vtrunc.f32 %v381_v0  ;;  %v391_v0 = vadd.f32 0.5, %v5743_v57 }
  0x79   : > { %v382_v15 = vadd.f32 0.5, %v5698_v51  ;;  %4462 = vmatmul.mubr.msk.f32.gmra.mrb[28].mxu1 %vm1354_vm5, %v5509_v55  ;;  %v5069_v55 = vtrunc.f32 %v385_v49  ;;  %v392_v49 = vadd.f32 0.5, %v5758_v50 }
  0x7a   : > { %4464 = vmatprep.mubr.msk.f32.mxu1 %vm1354_vm5, %v5532_v23  ;;  %v5062_v10 = vcvt.f32.s32 %v5061_v60  ;;  %v5066_v23 = vcvt.f32.s32 %v5065_v28  ;;  %v5076_v60 = vcvt.f32.s32 %v5075_v52 }
  0x7b   : > { %v5063_v31 = vtrunc.f32 %v382_v15 }
  0x7c   : > { %724 = vperm.xlu1 %5247, %v5042_v59   ;;  %721 = vperm.xlu0 %5246, %v5040_v26   ;;  %v5710_v59 = vld [vmem:[%s5394_s29 + $0x1e0] sm:$0xff]  ;;  %v5060_v26 = vcvt.f32.s32 %v5059_v18  ;;  %v5081_v18 = vtrunc.f32 %v391_v0 }
  0x7d   : > { %v384_v56 = vadd.f32 0.5, %v5710_v59  ;;  %4465 = vmatmul.mubr.msk.f32.gmra.mrb[30].mxu1 %vm1354_vm5, %v5529_v22  ;;  %v5073_v22 = vtrunc.f32 %v387_v20 }
  0x7e   : > { %4467 = vmatprep.mubr.msk.f32.mxu1 %vm1354_vm5, %v5540_v38  ;;  %v5070_v38 = vcvt.f32.s32 %v5069_v55  ;;  %v5082_v55 = vcvt.f32.s32 %v5081_v18  ;;  %v5816_v18 = vld [vmem:[%s5394_s29 + $0x268] sm:$0xff] }
  0x80   : > { %730 = vperm.xlu1 %5247, %v5046_v36   ;;  %727 = vperm.xlu0 %5246, %v5044_v42   ;;  %v5064_v36 = vcvt.f32.s32 %v5063_v31  ;;  %v5067_v42 = vtrunc.f32 %v384_v56  ;;  %v5769_v56 = vld [vmem:[%s5394_s29 + $0x238] sm:$0xff] }
  0x81   : > { %4468 = vmatmul.mubr.msk.f32.gmra.mrb[32].mxu1 %vm1354_vm5, %v5537_v37  ;;  %v5074_v37 = vcvt.f32.s32 %v5073_v22  ;;  %v395_v28 = vadd.f32 0.5, %v5769_v56 }
  0x82   : > { %4470 = vmatprep.mubr.msk.f32.mxu1 %vm1354_vm5, %v5554_v2 }
  0x84   : > { %736 = vperm.xlu1 %5247, %v5050_v30   ;;  %733 = vperm.xlu0 %5246, %v5048_v1   ;;  %v5068_v30 = vcvt.f32.s32 %v5067_v42  ;;  %v5071_v1 = vtrunc.f32 %v386_v45  ;;  %v5314_v42 = vmov 0.0  }
  0x85   : > { %4471 = vmatmul.mubr.msk.f32.gmra.mrb[34].mxu1 %vm1354_vm5, %v5551_v53  ;;  %v5762_v53 = vand.u32 127, %v580_v9 }
  0x86   : > { %4473 = vmatprep.mubr.msk.f32.mxu1 %vm1354_vm5, %v5566_v63  ;;  %v5072_v2 = vcvt.f32.s32 %v5071_v1 }
  0x88   : > { %742 = vperm.xlu1 %5247, %v5054_v29   ;;  %739 = vperm.xlu0 %5246, %v5052_v40   ;;  %v5746_v29 = vld [vmem:[%s5394_s29 + $0x210] sm:$0xff]  ;;  %v5077_v40 = vtrunc.f32 %v389_v44 }
  0x89   : > { %v390_v4 = vadd.f32 0.5, %v5746_v29  ;;  %4474 = vmatmul.mubr.msk.f32.gmra.mrb[36].mxu1 %vm1354_vm5, %v5563_v62 }
  0x8a   : > { %v5078_v63 = vcvt.f32.s32 %v5077_v40  ;;  %4476 = vmatprep.mubr.msk.f32.mxu1 %vm1354_vm5, %v5578_v13  ;;  %v5800_v40 = vld [vmem:[%s5394_s29 + $0x258] sm:$0xff] }
  0x8b   : > { %v5079_v15 = vtrunc.f32 %v390_v4 }
  0x8c   : > { %748 = vperm.xlu1 %5247, %v5058_v39   ;;  %745 = vperm.xlu0 %5246, %v5056_v14   ;;  %v5755_v39 = vld [vmem:[%s5394_s29 + $0x228] sm:$0xff] }
  0x8d   : > { %v393_v14 = vadd.f32 0.5, %v5755_v39  ;;  %4477 = vmatmul.mubr.msk.f32.gmra.mrb[38].mxu1 %vm1354_vm5, %v5575_v12  ;;  %v5080_v20 = vcvt.f32.s32 %v5079_v15  ;;  %v5785_v12 = vld [vmem:[%s5394_s29 + $0x240] sm:$0xff] }
  0x8e   : > { %4479 = vmatprep.mubr.msk.f32.mxu1 %vm1354_vm5, %v5590_v25  ;;  %v396_v1 = vadd.f32 0.5, %v5785_v12 }
  0x8f   : > { %v5085_v13 = vtrunc.f32 %v393_v14 }
  0x90   : > { %754 = vperm.xlu1 %5247, %v5062_v10   ;;  %751 = vperm.xlu0 %5246, %v5060_v26   ;;  %v5772_v10 = vld [vmem:[%s5394_s29 + $0x230] sm:$0xff] }
  0x91   : > { %v394_v31 = vadd.f32 0.5, %v5772_v10  ;;  %4480 = vmatmul.mubr.msk.f32.gmra.mrb[40].mxu1 %vm1354_vm5, %v5587_v24  ;;  %v5086_v44 = vcvt.f32.s32 %v5085_v13 }
  0x92   : > { %4482 = vmatprep.mubr.msk.f32.mxu1 %vm1354_vm5, %v5602_v41 }
  0x93   : > { %v5087_v24 = vtrunc.f32 %v394_v31  ;;  %v401_v31 = vadd.f32 0.5, %v5816_v18 }
  0x94   : > { %760 = vperm.xlu1 %5247, %v5066_v23   ;;  %757 = vperm.xlu0 %5246, %v5064_v36   ;;  %v5083_v23 = vtrunc.f32 %v392_v49  ;;  %v5782_v36 = vld [vmem:[%s5394_s29 + $0x248] sm:$0xff] }
  0x95   : > { %4483 = vmatmul.mubr.msk.f32.gmra.mrb[42].mxu1 %vm1354_vm5, %v5599_v34  ;;  %v5088_v14 = vcvt.f32.s32 %v5087_v24 }
  0x96   : > { %4485 = vmatprep.mubr.msk.f32.mxu1 %vm1354_vm5, %v5614_v7 }
  0x98   : > { %766 = vperm.xlu1 %5247, %v5070_v38   ;;  %763 = vperm.xlu0 %5246, %v5068_v30   ;;  %v5089_v38 = vtrunc.f32 %v395_v28  ;;  %v397_v30 = vadd.f32 0.5, %v5782_v36 }
  0x99   : > { %4486 = vmatmul.mubr.msk.f32.gmra.mrb[44].mxu1 %vm1354_vm5, %v5611_v48  ;;  %v5836_v48 = vld [vmem:[%s5394_s29 + $0x278] sm:$0xff] }
  0x9a   : > { %v5090_v0 = vcvt.f32.s32 %v5089_v38  ;;  %v5093_v4 = vtrunc.f32 %v397_v30  ;;  %4488 = vmatprep.mubr.msk.f32.mxu1 %vm1354_vm5, %v5626_v3  ;;  %v5101_v38 = vtrunc.f32 %v401_v31  ;;  %v403_v30 = vadd.f32 0.5, %v5836_v48 }
  0x9c   : > { %772 = vperm.xlu1 %5247, %v5074_v37   ;;  %769 = vperm.xlu0 %5246, %v5072_v2   ;;  %v5084_v37 = vcvt.f32.s32 %v5083_v23  ;;  %v5803_v2 = vld [vmem:[%s5394_s29 + $0x250] sm:$0xff]  ;;  %v5094_v13 = vcvt.f32.s32 %v5093_v4  ;;  %v5105_v4 = vtrunc.f32 %v403_v30 }
  0x9d   : > { %v398_v34 = vadd.f32 0.5, %v5803_v2  ;;  %4489 = vmatmul.mubr.msk.f32.gmra.mrb[46].mxu1 %vm1354_vm5, %v5623_v61  ;;  %v5856_v61 = vld [vmem:[%s5394_s29 + $0x288] sm:$0xff] }
  0x9e   : > { %4491 = vmatprep.mubr.msk.f32.mxu1 %vm1354_vm5, %v5638_v8 }
  0x9f   : > { %v590_v62 = vpop.permute.xlu1 %589  ;;  %v584_v26 = vpop.permute.xlu0 %583 }
  0xa0   : > { %778 = vperm.xlu1 %5247, %v5078_v63   ;;  %775 = vperm.xlu0 %5246, %v5076_v60   ;;  %vm966_vm7 = vcmp.eq.s32.totalorder %v5762_v53, %v584_v26  ;;  %vm968_vm8 = vcmp.eq.s32.totalorder %v5762_v53, %v590_v62  ;;  %v5091_v63 = vtrunc.f32 %v396_v1  ;;  %v399_v60 = vadd.f32 0.5, %v5800_v40  ;;  %v5823_v62 = vld [vmem:[%s5394_s29 + $0x260] sm:$0xff] }
  0xa1   : > { %v3759_v45 = vsel %vm966_vm7, 1.0, %v5314_v42  ;;  %v3761_v54 = vsel %vm968_vm8, 1.0, %v5314_v42  ;;  %v400_v23 = vadd.f32 0.5, %v5823_v62  ;;  %4492 = vmatmul.mubr.msk.f32.gmra.mrb[48].mxu1 %vm1354_vm5, %v5635_v11 }
  0xa2   : > { %4615 = vmatprep.mubr.msk.f32.mxu0 %vm2448_vm6, %v3759_v45  ;;  %v5092_v28 = vcvt.f32.s32 %v5091_v63  ;;  %v5839_v45 = vld [vmem:[%s5394_s29 + $0x270] sm:$0xff]  ;;  %v405_v63 = vadd.f32 0.5, %v5856_v61  ;;  %4494 = vmatprep.mubr.msk.f32.mxu1 %vm1354_vm5, %v5650_v16 }
  0xa3   : > { %v593_v25 = vpop.permute.xlu1 %592  ;;  %v587_v22 = vpop.permute.xlu0 %586  ;;  %v402_v1 = vadd.f32 0.5, %v5839_v45  ;;  %v5099_v24 = vtrunc.f32 %v400_v23 }
  0xa4   : > { %vm967_vm9 = vcmp.eq.s32.totalorder %v5762_v53, %v587_v22  ;;  %784 = vperm.xlu1 %5247, %v5082_v55   ;;  %781 = vperm.xlu0 %5246, %v5080_v20   ;;  %vm969_vm10 = vcmp.eq.s32.totalorder %v5762_v53, %v593_v25  ;;  %v5097_v55 = vtrunc.f32 %v399_v60  ;;  %v5095_v20 = vtrunc.f32 %v398_v34 }
  0xa5   : > { %v3760_v9 = vsel %vm967_vm9, 1.0, %v5314_v42  ;;  %v3762_v15 = vsel %vm969_vm10, 1.0, %v5314_v42  ;;  %v5102_v60 = vcvt.f32.s32 %v5101_v38  ;;  %v5100_v11 = vcvt.f32.s32 %v5099_v24  ;;  %4495 = vmatmul.mubr.msk.f32.gmra.mrb[50].mxu1 %vm1354_vm5, %v5647_v21 }
  0xa6   : > { %4616 = vmatmul.mubr.msk.f32.vlgmr.msra.gmra.mrb[0].mxu0 %vm2448_vm6, %v3760_v9  ;;  %v5859_v9 = vld [vmem:[%s5394_s29 + $0x280] sm:$0xff]  ;;  %v5103_v34 = vtrunc.f32 %v402_v1  ;;  %v5109_v31 = vtrunc.f32 %v405_v63  ;;  %4497 = vmatprep.mubr.msk.f32.mxu1 %vm1354_vm5, %v5662_v27 }
  0xa7   : > { %v599_v41 = vpop.permute.xlu1 %598  ;;  %4618 = vmatprep.mubr.msk.f32.mxu0 %vm2448_vm6, %v3761_v54  ;;  %v596_v52 = vpop.permute.xlu0 %595  ;;  %v5098_v54 = vcvt.f32.s32 %v5097_v55 }
  0xa8   : > { %vm970_vm11 = vcmp.eq.s32.totalorder %v5762_v53, %v596_v52  ;;  %790 = vperm.xlu1 %5247, %v5086_v44   ;;  %787 = vperm.xlu0 %5246, %v5084_v37   ;;  %vm971_vm12 = vcmp.eq.s32.totalorder %v5762_v53, %v599_v41  ;;  %v5096_v37 = vcvt.f32.s32 %v5095_v20  ;;  %v5104_v20 = vcvt.f32.s32 %v5103_v34 }
  0xa9   : > { %v3763_v49 = vsel %vm970_vm11, 1.0, %v5314_v42  ;;  %v3764_v25 = vsel %vm971_vm12, 1.0, %v5314_v42  ;;  %4498 = vmatmul.mubr.msk.f32.gmra.mrb[52].mxu1 %vm1354_vm5, %v5659_v33  ;;  %v5110_v30 = vcvt.f32.s32 %v5109_v31  ;;  %v5916_v33 = vld [vmem:[%s5394_s29 + $0x2b8] sm:$0xff] }
  0xaa   : > { %4619 = vmatmul.mubr.msk.f32.gmra.mrb[2].mxu0 %vm2448_vm6, %v3762_v15  ;;  %4500 = vmatprep.mubr.msk.f32.mxu1 %vm1354_vm5, %v5674_v35 }
  0xab   : > { %v605_v7 = vpop.permute.xlu1 %604  ;;  %4621 = vmatprep.mubr.msk.f32.mxu0 %vm2448_vm6, %v3763_v49  ;;  %v602_v26 = vpop.permute.xlu0 %601 }
  0xac   : > { %vm972_vm13 = vcmp.eq.s32.totalorder %v5762_v53, %v602_v26  ;;  %796 = vperm.xlu1 %5247, %v5090_v0   ;;  %793 = vperm.xlu0 %5246, %v5088_v14   ;;  %vm973_vm14 = vcmp.eq.s32.totalorder %v5762_v53, %v605_v7  ;;  %v404_v14 = vadd.f32 0.5, %v5859_v9  ;;  %v5880_v7 = vld [vmem:[%s5394_s29 + $0x298] sm:$0xff]  ;;  %v5883_v26 = vld [vmem:[%s5394_s29 + $0x290] sm:$0xff] }
  0xad   : > { %v3765_v22 = vsel %vm972_vm13, 1.0, %v5314_v42  ;;  %v3766_v41 = vsel %vm973_vm14, 1.0, %v5314_v42  ;;  %v407_v23 = vadd.f32 0.5, %v5880_v7  ;;  %v406_v21 = vadd.f32 0.5, %v5883_v26  ;;  %4501 = vmatmul.mubr.msk.f32.gmra.mrb[54].mxu1 %vm1354_vm5, %v5671_v47  ;;  %v5936_v47 = vld [vmem:[%s5394_s29 + $0x2c8] sm:$0xff] }
  0xae   : > { %4622 = vmatmul.mubr.msk.f32.gmra.mrb[4].mxu0 %vm2448_vm6, %v3764_v25  ;;  %v5107_v55 = vtrunc.f32 %v404_v14  ;;  %v5896_v25 = vld [vmem:[%s5394_s29 + $0x2a8] sm:$0xff]  ;;  %v411_v14 = vadd.f32 0.5, %v5916_v33  ;;  %4503 = vmatprep.mubr.msk.f32.mxu1 %vm1354_vm5, %v5686_v43 }
  0xaf   : > { %v611_v3 = vpop.permute.xlu1 %610  ;;  %4624 = vmatprep.mubr.msk.f32.mxu0 %vm2448_vm6, %v3765_v22  ;;  %v608_v44 = vpop.permute.xlu0 %607  ;;  %v5111_v24 = vtrunc.f32 %v406_v21 }
  0xb0   : > { %vm974_vm15 = vcmp.eq.s32.totalorder %v5762_v53, %v608_v44  ;;  %802 = vperm.xlu1 %5247, %v5094_v13   ;;  %799 = vperm.xlu0 %5246, %v5092_v28   ;;  %vm975_vm0 = vcmp.eq.s32.totalorder %v5762_v53, %v611_v3  ;;  %v5106_v28 = vcvt.f32.s32 %v5105_v4  ;;  %v5903_v44 = vld [vmem:[%s5394_s29 + $0x2a0] sm:$0xff]  ;;  %v5108_v1 = vcvt.f32.s32 %v5107_v55 }
  0xb1   : > { %v3767_v52 = vsel %vm974_vm15, 1.0, %v5314_v42  ;;  %v3768_v15 = vsel %vm975_vm0, 1.0, %v5314_v42  ;;  %v5112_v34 = vcvt.f32.s32 %v5111_v24  ;;  %4504 = vmatmul.mubr.msk.f32.gmra.mrb[56].mxu1 %vm1354_vm5, %v5683_v58  ;;  %v5121_v31 = vtrunc.f32 %v411_v14 }
  0xb2   : > { %4625 = vmatmul.mubr.msk.f32.gmra.mrb[6].mxu0 %vm2448_vm6, %v3766_v41  ;;  %v408_v41 = vadd.f32 0.5, %v5903_v44  ;;  %v413_v55 = vadd.f32 0.5, %v5936_v47  ;;  %4506 = vmatprep.mubr.msk.f32.mxu1 %vm1354_vm5, %v5698_v51 }
  0xb3   : > { %v617_v8 = vpop.permute.xlu1 %616  ;;  %4627 = vmatprep.mubr.msk.f32.mxu0 %vm2448_vm6, %v3767_v52  ;;  %v614_v0 = vpop.permute.xlu0 %613  ;;  %v5919_v52 = vld [vmem:[%s5394_s29 + $0x2b0] sm:$0xff] }
  0xb4   : > { %vm976_vm1 = vcmp.eq.s32.totalorder %v5762_v53, %v614_v0  ;;  %808 = vperm.xlu1 %5247, %v5098_v54   ;;  %805 = vperm.xlu0 %5246, %v5096_v37   ;;  %vm977_vm2 = vcmp.eq.s32.totalorder %v5762_v53, %v617_v8  ;;  %v409_v54 = vadd.f32 0.5, %v5896_v25  ;;  %v5113_v37 = vtrunc.f32 %v407_v23 }
  0xb5   : > { %v3769_v49 = vsel %vm976_vm1, 1.0, %v5314_v42  ;;  %v3770_v22 = vsel %vm977_vm2, 1.0, %v5314_v42  ;;  %4507 = vmatmul.mubr.msk.f32.gmra.mrb[58].mxu1 %vm1354_vm5, %v5695_v5 }
  0xb6   : > { %4628 = vmatmul.mubr.msk.f32.gmra.mrb[8].mxu0 %vm2448_vm6, %v3768_v15  ;;  %v5117_v63 = vtrunc.f32 %v409_v54  ;;  %v5115_v15 = vtrunc.f32 %v408_v41  ;;  %v5125_v54 = vtrunc.f32 %v413_v55  ;;  %4509 = vmatprep.mubr.msk.f32.mxu1 %vm1354_vm5, %v5710_v59 }
  0xb7   : > { %v623_v16 = vpop.permute.xlu1 %622  ;;  %4630 = vmatprep.mubr.msk.f32.mxu0 %vm2448_vm6, %v3769_v49  ;;  %v620_v13 = vpop.permute.xlu0 %619  ;;  %v5939_v49 = vld [vmem:[%s5394_s29 + $0x2c0] sm:$0xff] }
  0xb8   : > { %vm978_vm3 = vcmp.eq.s32.totalorder %v5762_v53, %v620_v13  ;;  %814 = vperm.xlu1 %5247, %v5102_v60   ;;  %811 = vperm.xlu0 %5246, %v5100_v11   ;;  %vm979_vm4 = vcmp.eq.s32.totalorder %v5762_v53, %v623_v16  ;;  %v410_v60 = vadd.f32 0.5, %v5919_v52  ;;  %v5114_v11 = vcvt.f32.s32 %v5113_v37 }
  0xb9   : > { %v3771_v3 = vsel %vm978_vm3, 1.0, %v5314_v42  ;;  %v3772_v8 = vsel %vm979_vm4, 1.0, %v5314_v42  ;;  %v5118_v23 = vcvt.f32.s32 %v5117_v63  ;;  %v5116_v58 = vcvt.f32.s32 %v5115_v15  ;;  %4510 = vmatmul.mubr.msk.f32.gmra.mrb[60].mxu1 %vm1354_vm5, %v5707_v17  ;;  %v5996_v17 = vld [vmem:[%s5394_s29 + $0x2f8] sm:$0xff] }
  0xba   : > { %4631 = vmatmul.mubr.msk.f32.gmra.mrb[10].mxu0 %vm2448_vm6, %v3770_v22  ;;  %v5119_v21 = vtrunc.f32 %v410_v60  ;;  %v5126_v14 = vcvt.f32.s32 %v5125_v54  ;;  %4512 = vmatprep.mubr.msk.f32.mxu1 %vm1354_vm5, %v5722_v6 }
  0xbb   : > { %v629_v27 = vpop.permute.xlu1 %628  ;;  %4633 = vmatprep.mubr.msk.f32.mxu0 %vm2448_vm6, %v3771_v3  ;;  %v626_v38 = vpop.permute.xlu0 %625 }
  0xbc   : > { %vm980_vm7 = vcmp.eq.s32.totalorder %v5762_v53, %v626_v38  ;;  %820 = vperm.xlu1 %5247, %v5106_v28   ;;  %817 = vperm.xlu0 %5246, %v5104_v20   ;;  %vm981_vm8 = vcmp.eq.s32.totalorder %v5762_v53, %v629_v27  ;;  %v412_v20 = vadd.f32 0.5, %v5939_v49  ;;  %v5960_v27 = vld [vmem:[%s5394_s29 + $0x2d8] sm:$0xff]  ;;  %v5963_v38 = vld [vmem:[%s5394_s29 + $0x2d0] sm:$0xff]  ;;  %v5120_v24 = vcvt.f32.s32 %v5119_v21 }
  0xbd   : > { %v3773_v0 = vsel %vm980_vm7, 1.0, %v5314_v42  ;;  %v3774_v16 = vsel %vm981_vm8, 1.0, %v5314_v42  ;;  %v415_v41 = vadd.f32 0.5, %v5960_v27  ;;  %v414_v5 = vadd.f32 0.5, %v5963_v38  ;;  %4513 = vmatmul.mubr.msk.f32.gmra.mrb[62].mxu1 %vm1354_vm5, %v5719_v32  ;;  %v6016_v32 = vld [vmem:[%s5394_s29 + $0x308] sm:$0xff] }
  0xbe   : > { %4634 = vmatmul.mubr.msk.f32.gmra.mrb[12].mxu0 %vm2448_vm6, %v3772_v8  ;;  %v5123_v37 = vtrunc.f32 %v412_v20  ;;  %v5976_v8 = vld [vmem:[%s5394_s29 + $0x2e8] sm:$0xff]  ;;  %v419_v20 = vadd.f32 0.5, %v5996_v17  ;;  %4515 = vmatprep.mubr.msk.f32.mxu1 %vm1354_vm5, %v5734_v19 }
  0xbf   : > { %v635_v35 = vpop.permute.xlu1 %634  ;;  %4636 = vmatprep.mubr.msk.f32.mxu0 %vm2448_vm6, %v3773_v0  ;;  %v632_v4 = vpop.permute.xlu0 %631  ;;  %v5127_v15 = vtrunc.f32 %v414_v5 }
  0xc0   : > { %vm982_vm9 = vcmp.eq.s32.totalorder %v5762_v53, %v632_v4  ;;  %826 = vperm.xlu1 %5247, %v5110_v30   ;;  %823 = vperm.xlu0 %5246, %v5108_v1   ;;  %vm983_vm10 = vcmp.eq.s32.totalorder %v5762_v53, %v635_v35  ;;  %v5122_v1 = vcvt.f32.s32 %v5121_v31  ;;  %v5983_v4 = vld [vmem:[%s5394_s29 + $0x2e0] sm:$0xff]  ;;  %v5124_v60 = vcvt.f32.s32 %v5123_v37 }
  0xc1   : > { %v3775_v13 = vsel %vm982_vm9, 1.0, %v5314_v42  ;;  %v3776_v22 = vsel %vm983_vm10, 1.0, %v5314_v42  ;;  %v5128_v21 = vcvt.f32.s32 %v5127_v15  ;;  %4516 = vmatmul.mubr.msk.f32.gmra.mrb[64].mxu1 %vm1354_vm5, %v5731_v46  ;;  %v5137_v54 = vtrunc.f32 %v419_v20 }
  0xc2   : > { %4637 = vmatmul.mubr.msk.f32.gmra.mrb[14].mxu0 %vm2448_vm6, %v3774_v16  ;;  %v416_v16 = vadd.f32 0.5, %v5983_v4  ;;  %v421_v37 = vadd.f32 0.5, %v6016_v32  ;;  %4518 = vmatprep.mubr.msk.f32.mxu1 %vm1354_vm5, %v5746_v29 }
  0xc3   : > { %v641_v43 = vpop.permute.xlu1 %640  ;;  %4639 = vmatprep.mubr.msk.f32.mxu0 %vm2448_vm6, %v3775_v13  ;;  %v638_v28 = vpop.permute.xlu0 %637  ;;  %v5999_v13 = vld [vmem:[%s5394_s29 + $0x2f0] sm:$0xff] }
  0xc4   : > { %vm984_vm11 = vcmp.eq.s32.totalorder %v5762_v53, %v638_v28  ;;  %832 = vperm.xlu1 %5247, %v5114_v11   ;;  %829 = vperm.xlu0 %5246, %v5112_v34   ;;  %vm985_vm12 = vcmp.eq.s32.totalorder %v5762_v53, %v641_v43  ;;  %v417_v11 = vadd.f32 0.5, %v5976_v8  ;;  %v5129_v34 = vtrunc.f32 %v415_v41 }
  0xc5   : > { %v3777_v3 = vsel %vm984_vm11, 1.0, %v5314_v42  ;;  %v3778_v0 = vsel %vm985_vm12, 1.0, %v5314_v42  ;;  %4519 = vmatmul.mubr.msk.f32.gmra.mrb[66].mxu1 %vm1354_vm5, %v5743_v57 }
  0xc6   : > { %4640 = vmatmul.mubr.msk.f32.gmra.mrb[16].mxu0 %vm2448_vm6, %v3776_v22  ;;  %v5133_v55 = vtrunc.f32 %v417_v11  ;;  %v5131_v22 = vtrunc.f32 %v416_v16  ;;  %v5141_v11 = vtrunc.f32 %v421_v37  ;;  %4521 = vmatprep.mubr.msk.f32.mxu1 %vm1354_vm5, %v5758_v50 }
  0xc7   : > { %v647_v51 = vpop.permute.xlu1 %646  ;;  %4642 = vmatprep.mubr.msk.f32.mxu0 %vm2448_vm6, %v3777_v3  ;;  %v644_v30 = vpop.permute.xlu0 %643  ;;  %v6019_v3 = vld [vmem:[%s5394_s29 + $0x300] sm:$0xff] }
  0xc8   : > { %vm986_vm13 = vcmp.eq.s32.totalorder %v5762_v53, %v644_v30  ;;  %838 = vperm.xlu1 %5247, %v5118_v23   ;;  %835 = vperm.xlu0 %5246, %v5116_v58   ;;  %vm987_vm14 = vcmp.eq.s32.totalorder %v5762_v53, %v647_v51  ;;  %v418_v23 = vadd.f32 0.5, %v5999_v13  ;;  %v5130_v58 = vcvt.f32.s32 %v5129_v34 }
  0xc9   : > { %v3779_v35 = vsel %vm986_vm13, 1.0, %v5314_v42  ;;  %v3780_v43 = vsel %vm987_vm14, 1.0, %v5314_v42  ;;  %v5134_v41 = vcvt.f32.s32 %v5133_v55  ;;  %v5132_v46 = vcvt.f32.s32 %v5131_v22  ;;  %4522 = vmatmul.mubr.msk.f32.gmra.mrb[68].mxu1 %vm1354_vm5, %v5755_v39  ;;  %v6076_v39 = vld [vmem:[%s5394_s29 + $0x338] sm:$0xff] }
  0xca   : > { %4643 = vmatmul.mubr.msk.f32.gmra.mrb[18].mxu0 %vm2448_vm6, %v3778_v0  ;;  %v5135_v5 = vtrunc.f32 %v418_v23  ;;  %v5142_v20 = vcvt.f32.s32 %v5141_v11  ;;  %4524 = vmatprep.mubr.msk.f32.mxu1 %vm1354_vm5, %v5772_v10 }
  0xcb   : > { %v653_v59 = vpop.permute.xlu1 %652  ;;  %4645 = vmatprep.mubr.msk.f32.mxu0 %vm2448_vm6, %v3779_v35  ;;  %v650_v63 = vpop.permute.xlu0 %649 }
  0xcc   : > { %vm988_vm15 = vcmp.eq.s32.totalorder %v5762_v53, %v650_v63  ;;  %844 = vperm.xlu1 %5247, %v5122_v1   ;;  %841 = vperm.xlu0 %5246, %v5120_v24   ;;  %vm989_vm0 = vcmp.eq.s32.totalorder %v5762_v53, %v653_v59  ;;  %v420_v24 = vadd.f32 0.5, %v6019_v3  ;;  %v6040_v59 = vld [vmem:[%s5394_s29 + $0x318] sm:$0xff]  ;;  %v6043_v63 = vld [vmem:[%s5394_s29 + $0x310] sm:$0xff]  ;;  %v5136_v15 = vcvt.f32.s32 %v5135_v5 }
  0xcd   : > { %v3781_v28 = vsel %vm988_vm15, 1.0, %v5314_v42  ;;  %v3782_v51 = vsel %vm989_vm0, 1.0, %v5314_v42  ;;  %v423_v16 = vadd.f32 0.5, %v6040_v59  ;;  %v422_v57 = vadd.f32 0.5, %v6043_v63  ;;  %4525 = vmatmul.mubr.msk.f32.gmra.mrb[70].mxu1 %vm1354_vm5, %v5769_v56  ;;  %v6096_v56 = vld [vmem:[%s5394_s29 + $0x348] sm:$0xff] }
  0xce   : > { %4646 = vmatmul.mubr.msk.f32.gmra.mrb[20].mxu0 %vm2448_vm6, %v3780_v43  ;;  %v5139_v34 = vtrunc.f32 %v420_v24  ;;  %v6056_v43 = vld [vmem:[%s5394_s29 + $0x328] sm:$0xff]  ;;  %v427_v24 = vadd.f32 0.5, %v6076_v39  ;;  %4527 = vmatprep.mubr.msk.f32.mxu1 %vm1354_vm5, %v5785_v12 }
  0xcf   : > { %v659_v6 = vpop.permute.xlu1 %658  ;;  %4648 = vmatprep.mubr.msk.f32.mxu0 %vm2448_vm6, %v3781_v28  ;;  %v656_v31 = vpop.permute.xlu0 %655  ;;  %v5143_v22 = vtrunc.f32 %v422_v57 }
  0xd0   : > { %vm990_vm1 = vcmp.eq.s32.totalorder %v5762_v53, %v656_v31  ;;  %850 = vperm.xlu1 %5247, %v5126_v14   ;;  %847 = vperm.xlu0 %5246, %v5124_v60   ;;  %vm991_vm2 = vcmp.eq.s32.totalorder %v5762_v53, %v659_v6  ;;  %v5138_v60 = vcvt.f32.s32 %v5137_v54  ;;  %v6063_v31 = vld [vmem:[%s5394_s29 + $0x320] sm:$0xff]  ;;  %v5140_v23 = vcvt.f32.s32 %v5139_v34 }
  0xd1   : > { %v3783_v30 = vsel %vm990_vm1, 1.0, %v5314_v42  ;;  %v3784_v0 = vsel %vm991_vm2, 1.0, %v5314_v42  ;;  %v5144_v5 = vcvt.f32.s32 %v5143_v22  ;;  %4528 = vmatmul.mubr.msk.f32.gmra.mrb[72].mxu1 %vm1354_vm5, %v5782_v36  ;;  %v5153_v11 = vtrunc.f32 %v427_v24 }
  0xd2   : > { %4649 = vmatmul.mubr.msk.f32.gmra.mrb[22].mxu0 %vm2448_vm6, %v3782_v51  ;;  %v424_v51 = vadd.f32 0.5, %v6063_v31  ;;  %v429_v34 = vadd.f32 0.5, %v6096_v56  ;;  %4530 = vmatprep.mubr.msk.f32.mxu1 %vm1354_vm5, %v5803_v2 }
  0xd3   : > { %v665_v19 = vpop.permute.xlu1 %664  ;;  %4651 = vmatprep.mubr.msk.f32.mxu0 %vm2448_vm6, %v3783_v30  ;;  %v662_v1 = vpop.permute.xlu0 %661  ;;  %v6079_v30 = vld [vmem:[%s5394_s29 + $0x330] sm:$0xff]  ;;  %v5154_v22 = vcvt.f32.s32 %v5153_v11 }
  0xd4   : > { %vm992_vm3 = vcmp.eq.s32.totalorder %v5762_v53, %v662_v1  ;;  %856 = vperm.xlu1 %5247, %v5130_v58   ;;  %853 = vperm.xlu0 %5246, %v5128_v21   ;;  %vm993_vm4 = vcmp.eq.s32.totalorder %v5762_v53, %v665_v19  ;;  %v425_v58 = vadd.f32 0.5, %v6056_v43  ;;  %v5145_v21 = vtrunc.f32 %v423_v16 }
  0xd5   : > { %v3785_v35 = vsel %vm992_vm3, 1.0, %v5314_v42  ;;  %v3786_v28 = vsel %vm993_vm4, 1.0, %v5314_v42  ;;  %4531 = vmatmul.mubr.msk.f32.gmra.mrb[74].mxu1 %vm1354_vm5, %v5800_v40 }
  0xd6   : > { %4652 = vmatmul.mubr.msk.f32.gmra.mrb[24].mxu0 %vm2448_vm6, %v3784_v0  ;;  %v5149_v37 = vtrunc.f32 %v425_v58  ;;  %v5147_v0 = vtrunc.f32 %v424_v51  ;;  %4533 = vmatprep.mubr.msk.f32.mxu1 %vm1354_vm5, %v5823_v62 }
  0xd7   : > { %v671_v29 = vpop.permute.xlu1 %670  ;;  %4654 = vmatprep.mubr.msk.f32.mxu0 %vm2448_vm6, %v3785_v35  ;;  %v668_v14 = vpop.permute.xlu0 %667  ;;  %v6099_v35 = vld [vmem:[%s5394_s29 + $0x340] sm:$0xff] }
  0xd8   : > { %vm994_vm7 = vcmp.eq.s32.totalorder %v5762_v53, %v668_v14  ;;  %862 = vperm.xlu1 %5247, %v5134_v41   ;;  %859 = vperm.xlu0 %5246, %v5132_v46   ;;  %vm995_vm8 = vcmp.eq.s32.totalorder %v5762_v53, %v671_v29  ;;  %v426_v41 = vadd.f32 0.5, %v6079_v30  ;;  %v5146_v46 = vcvt.f32.s32 %v5145_v21 }
  0xd9   : > { %v3787_v6 = vsel %vm994_vm7, 1.0, %v5314_v42  ;;  %v3788_v19 = vsel %vm995_vm8, 1.0, %v5314_v42  ;;  %v5150_v16 = vcvt.f32.s32 %v5149_v37  ;;  %v5148_v57 = vcvt.f32.s32 %v5147_v0  ;;  %4534 = vmatmul.mubr.msk.f32.gmra.mrb[76].mxu1 %vm1354_vm5, %v5816_v18  ;;  %v6156_v18 = vld [vmem:[%s5394_s29 + $0x378] sm:$0xff] }
  0xda   : > { %4655 = vmatmul.mubr.msk.f32.gmra.mrb[26].mxu0 %vm2448_vm6, %v3786_v28  ;;  %v5151_v36 = vtrunc.f32 %v426_v41  ;;  %v6116_v28 = vld [vmem:[%s5394_s29 + $0x358] sm:$0xff]  ;;  %4536 = vmatprep.mubr.msk.f32.mxu1 %vm1354_vm5, %v5839_v45 }
  0xdb   : > { %v677_v50 = vpop.permute.xlu1 %676  ;;  %4657 = vmatprep.mubr.msk.f32.mxu0 %vm2448_vm6, %v3787_v6  ;;  %v674_v55 = vpop.permute.xlu0 %673  ;;  %v431_v21 = vadd.f32 0.5, %v6116_v28 }
  0xdc   : > { %vm996_vm9 = vcmp.eq.s32.totalorder %v5762_v53, %v674_v55  ;;  %868 = vperm.xlu1 %5247, %v5138_v60   ;;  %865 = vperm.xlu0 %5246, %v5136_v15   ;;  %vm997_vm10 = vcmp.eq.s32.totalorder %v5762_v53, %v677_v50  ;;  %v428_v15 = vadd.f32 0.5, %v6099_v35  ;;  %v6123_v55 = vld [vmem:[%s5394_s29 + $0x350] sm:$0xff]  ;;  %v5152_v51 = vcvt.f32.s32 %v5151_v36 }
  0xdd   : > { %v3789_v1 = vsel %vm996_vm9, 1.0, %v5314_v42  ;;  %v3790_v29 = vsel %vm997_vm10, 1.0, %v5314_v42  ;;  %v430_v40 = vadd.f32 0.5, %v6123_v55  ;;  %4537 = vmatmul.mubr.msk.f32.gmra.mrb[78].mxu1 %vm1354_vm5, %v5836_v48 }
  0xde   : > { %4658 = vmatmul.mubr.msk.f32.gmra.mrb[28].mxu0 %vm2448_vm6, %v3788_v19  ;;  %v5155_v58 = vtrunc.f32 %v428_v15  ;;  %v435_v15 = vadd.f32 0.5, %v6156_v18  ;;  %4539 = vmatprep.mubr.msk.f32.mxu1 %vm1354_vm5, %v5859_v9 }
  0xdf   : > { %v683_v10 = vpop.permute.xlu1 %682  ;;  %4660 = vmatprep.mubr.msk.f32.mxu0 %vm2448_vm6, %v3789_v1  ;;  %v680_v54 = vpop.permute.xlu0 %679 }
  0xe0   : > { %vm998_vm11 = vcmp.eq.s32.totalorder %v5762_v53, %v680_v54  ;;  %874 = vperm.xlu1 %5247, %v5142_v20   ;;  %871 = vperm.xlu0 %5246, %v5140_v23   ;;  %vm999_vm12 = vcmp.eq.s32.totalorder %v5762_v53, %v683_v10  ;;  %v5157_v23 = vtrunc.f32 %v429_v34  ;;  %v6140_v10 = vld [vmem:[%s5394_s29 + $0x368] sm:$0xff]  ;;  %v6143_v54 = vld [vmem:[%s5394_s29 + $0x360] sm:$0xff]  ;;  %v5156_v41 = vcvt.f32.s32 %v5155_v58 }
  0xe1   : > { %v3791_v14 = vsel %vm998_vm11, 1.0, %v5314_v42  ;;  %v3792_v6 = vsel %vm999_vm12, 1.0, %v5314_v42  ;;  %v433_v0 = vadd.f32 0.5, %v6140_v10  ;;  %4540 = vmatmul.mubr.msk.f32.gmra.mrb[80].mxu1 %vm1354_vm5, %v5856_v61  ;;  %v5169_v58 = vtrunc.f32 %v435_v15 }
  0xe2   : > { %4661 = vmatmul.mubr.msk.f32.gmra.mrb[30].mxu0 %vm2448_vm6, %v3790_v29  ;;  %v5158_v24 = vcvt.f32.s32 %v5157_v23  ;;  %v432_v29 = vadd.f32 0.5, %v6143_v54  ;;  %4542 = vmatprep.mubr.msk.f32.mxu1 %vm1354_vm5, %v5883_v26 }
  0xe3   : > { %v689_v12 = vpop.permute.xlu1 %688  ;;  %4663 = vmatprep.mubr.msk.f32.mxu0 %vm2448_vm6, %v3791_v14  ;;  %v686_v60 = vpop.permute.xlu0 %685  ;;  %v6159_v14 = vld [vmem:[%s5394_s29 + $0x370] sm:$0xff]  ;;  %v5165_v36 = vtrunc.f32 %v433_v0 }
  0xe4   : > { %vm1000_vm13 = vcmp.eq.s32.totalorder %v5762_v53, %v686_v60  ;;  %880 = vperm.xlu1 %5247, %v5146_v46   ;;  %877 = vperm.xlu0 %5246, %v5144_v5   ;;  %vm1001_vm14 = vcmp.eq.s32.totalorder %v5762_v53, %v689_v12  ;;  %v5161_v46 = vtrunc.f32 %v431_v21  ;;  %v5159_v5 = vtrunc.f32 %v430_v40 }
  0xe5   : > { %v3793_v50 = vsel %vm1000_vm13, 1.0, %v5314_v42  ;;  %v3794_v19 = vsel %vm1001_vm14, 1.0, %v5314_v42  ;;  %v5163_v48 = vtrunc.f32 %v432_v29  ;;  %4543 = vmatmul.mubr.msk.f32.gmra.mrb[82].mxu1 %vm1354_vm5, %v5880_v7  ;;  %v6216_v7 = vld [vmem:[%s5394_s29 + $0x3a8] sm:$0xff] }
  0xe6   : > { %4664 = vmatmul.mubr.msk.f32.gmra.mrb[32].mxu0 %vm2448_vm6, %v3792_v6  ;;  %v5162_v34 = vcvt.f32.s32 %v5161_v46  ;;  %v6176_v6 = vld [vmem:[%s5394_s29 + $0x388] sm:$0xff]  ;;  %4545 = vmatprep.mubr.msk.f32.mxu1 %vm1354_vm5, %v5903_v44 }
  0xe7   : > { %v695_v2 = vpop.permute.xlu1 %694  ;;  %4666 = vmatprep.mubr.msk.f32.mxu0 %vm2448_vm6, %v3793_v50  ;;  %v692_v20 = vpop.permute.xlu0 %691  ;;  %v5164_v40 = vcvt.f32.s32 %v5163_v48 }
  0xe8   : > { %vm1002_vm15 = vcmp.eq.s32.totalorder %v5762_v53, %v692_v20  ;;  %886 = vperm.xlu1 %5247, %v5150_v16   ;;  %883 = vperm.xlu0 %5246, %v5148_v57   ;;  %vm1003_vm0 = vcmp.eq.s32.totalorder %v5762_v53, %v695_v2  ;;  %v434_v16 = vadd.f32 0.5, %v6159_v14  ;;  %v5160_v57 = vcvt.f32.s32 %v5159_v5  ;;  %v6183_v20 = vld [vmem:[%s5394_s29 + $0x380] sm:$0xff] }
  0xe9   : > { %v3795_v1 = vsel %vm1002_vm15, 1.0, %v5314_v42  ;;  %v3796_v12 = vsel %vm1003_vm0, 1.0, %v5314_v42  ;;  %v436_v61 = vadd.f32 0.5, %v6183_v20  ;;  %4546 = vmatmul.mubr.msk.f32.gmra.mrb[84].mxu1 %vm1354_vm5, %v5896_v25 }
  0xea   : > { %4667 = vmatmul.mubr.msk.f32.gmra.mrb[34].mxu0 %vm2448_vm6, %v3794_v19  ;;  %v5167_v21 = vtrunc.f32 %v434_v16  ;;  %v441_v16 = vadd.f32 0.5, %v6216_v7  ;;  %4548 = vmatprep.mubr.msk.f32.mxu1 %vm1354_vm5, %v5919_v52 }
  0xeb   : > { %v701_v62 = vpop.permute.xlu1 %700  ;;  %4669 = vmatprep.mubr.msk.f32.mxu0 %vm2448_vm6, %v3795_v1  ;;  %v698_v37 = vpop.permute.xlu0 %697  ;;  %v5171_v0 = vtrunc.f32 %v436_v61 }
  0xec   : > { %vm1004_vm1 = vcmp.eq.s32.totalorder %v5762_v53, %v698_v37  ;;  %892 = vperm.xlu1 %5247, %v5154_v22   ;;  %889 = vperm.xlu0 %5246, %v5152_v51   ;;  %vm1005_vm2 = vcmp.eq.s32.totalorder %v5762_v53, %v701_v62  ;;  %v437_v22 = vadd.f32 0.5, %v6176_v6  ;;  %v5166_v51 = vcvt.f32.s32 %v5165_v36  ;;  %v6200_v62 = vld [vmem:[%s5394_s29 + $0x398] sm:$0xff]  ;;  %v6203_v37 = vld [vmem:[%s5394_s29 + $0x390] sm:$0xff] }
  0xed   : > { %v3797_v60 = vsel %vm1004_vm1, 1.0, %v5314_v42  ;;  %v3798_v50 = vsel %vm1005_vm2, 1.0, %v5314_v42  ;;  %v5168_v46 = vcvt.f32.s32 %v5167_v21  ;;  %v439_v29 = vadd.f32 0.5, %v6200_v62  ;;  %4549 = vmatmul.mubr.msk.f32.gmra.mrb[86].mxu1 %vm1354_vm5, %v5916_v33 }
  0xee   : > { %4670 = vmatmul.mubr.msk.f32.gmra.mrb[36].mxu0 %vm2448_vm6, %v3796_v12  ;;  %v5173_v5 = vtrunc.f32 %v437_v22  ;;  %v438_v12 = vadd.f32 0.5, %v6203_v37  ;;  %v5172_v36 = vcvt.f32.s32 %v5171_v0  ;;  %v5181_v21 = vtrunc.f32 %v441_v16  ;;  %4551 = vmatprep.mubr.msk.f32.mxu1 %vm1354_vm5, %v5939_v49 }
  0xef   : > { %v707_v45 = vpop.permute.xlu1 %706  ;;  %4672 = vmatprep.mubr.msk.f32.mxu0 %vm2448_vm6, %v3797_v60  ;;  %v704_v11 = vpop.permute.xlu0 %703  ;;  %v6219_v60 = vld [vmem:[%s5394_s29 + $0x3a0] sm:$0xff]  ;;  %v5177_v48 = vtrunc.f32 %v439_v29 }
  0xf0   : > { %vm1006_vm3 = vcmp.eq.s32.totalorder %v5762_v53, %v704_v11  ;;  %898 = vperm.xlu1 %5247, %v5158_v24   ;;  %895 = vperm.xlu0 %5246, %v5156_v41   ;;  %vm1007_vm4 = vcmp.eq.s32.totalorder %v5762_v53, %v707_v45  ;;  %v5170_v41 = vcvt.f32.s32 %v5169_v58  ;;  %v5174_v15 = vcvt.f32.s32 %v5173_v5 }
  0xf1   : > { %v3799_v2 = vsel %vm1006_vm3, 1.0, %v5314_v42  ;;  %v3800_v19 = vsel %vm1007_vm4, 1.0, %v5314_v42  ;;  %v5175_v25 = vtrunc.f32 %v438_v12  ;;  %4552 = vmatmul.mubr.msk.f32.gmra.mrb[88].mxu1 %vm1354_vm5, %v5936_v47  ;;  %v6276_v47 = vld [vmem:[%s5394_s29 + $0x3d8] sm:$0xff] }
  0xf2   : > { %4673 = vmatmul.mubr.msk.f32.gmra.mrb[38].mxu0 %vm2448_vm6, %v3798_v50  ;;  %v6236_v50 = vld [vmem:[%s5394_s29 + $0x3b8] sm:$0xff]  ;;  %4554 = vmatprep.mubr.msk.f32.mxu1 %vm1354_vm5, %v5963_v38 }
  0xf3   : > { %v713_v9 = vpop.permute.xlu1 %712  ;;  %4675 = vmatprep.mubr.msk.f32.mxu0 %vm2448_vm6, %v3799_v2  ;;  %v710_v23 = vpop.permute.xlu0 %709  ;;  %v5176_v61 = vcvt.f32.s32 %v5175_v25 }
  0xf4   : > { %vm1008_vm7 = vcmp.eq.s32.totalorder %v5762_v53, %v710_v23  ;;  %904 = vperm.xlu1 %5247, %v5162_v34   ;;  %901 = vperm.xlu0 %5246, %v5160_v57   ;;  %vm1009_vm8 = vcmp.eq.s32.totalorder %v5762_v53, %v713_v9  ;;  %v440_v57 = vadd.f32 0.5, %v6219_v60  ;;  %v6243_v23 = vld [vmem:[%s5394_s29 + $0x3b0] sm:$0xff] }
  0xf5   : > { %v3801_v1 = vsel %vm1008_vm7, 1.0, %v5314_v42  ;;  %v3802_v45 = vsel %vm1009_vm8, 1.0, %v5314_v42  ;;  %v442_v33 = vadd.f32 0.5, %v6243_v23  ;;  %4555 = vmatmul.mubr.msk.f32.gmra.mrb[90].mxu1 %vm1354_vm5, %v5960_v27 }
  0xf6   : > { %4676 = vmatmul.mubr.msk.f32.gmra.mrb[40].mxu0 %vm2448_vm6, %v3800_v19  ;;  %v5179_v22 = vtrunc.f32 %v440_v57  ;;  %v447_v57 = vadd.f32 0.5, %v6276_v47  ;;  %4557 = vmatprep.mubr.msk.f32.mxu1 %vm1354_vm5, %v5983_v4 }
  0xf7   : > { %v719_v26 = vpop.permute.xlu1 %718  ;;  %4678 = vmatprep.mubr.msk.f32.mxu0 %vm2448_vm6, %v3801_v1  ;;  %v716_v24 = vpop.permute.xlu0 %715  ;;  %v5183_v29 = vtrunc.f32 %v442_v33 }
  0xf8   : > { %vm1010_vm9 = vcmp.eq.s32.totalorder %v5762_v53, %v716_v24  ;;  %910 = vperm.xlu1 %5247, %v5166_v51   ;;  %907 = vperm.xlu0 %5246, %v5164_v40   ;;  %vm1011_vm10 = vcmp.eq.s32.totalorder %v5762_v53, %v719_v26  ;;  %v443_v51 = vadd.f32 0.5, %v6236_v50  ;;  %v5178_v40 = vcvt.f32.s32 %v5177_v48  ;;  %v6260_v26 = vld [vmem:[%s5394_s29 + $0x3c8] sm:$0xff]  ;;  %v6263_v24 = vld [vmem:[%s5394_s29 + $0x3c0] sm:$0xff] }
  0xf9   : > { %v3803_v11 = vsel %vm1010_vm9, 1.0, %v5314_v42  ;;  %v3804_v2 = vsel %vm1011_vm10, 1.0, %v5314_v42  ;;  %v5180_v5 = vcvt.f32.s32 %v5179_v22  ;;  %v445_v12 = vadd.f32 0.5, %v6260_v26  ;;  %4558 = vmatmul.mubr.msk.f32.gmra.mrb[92].mxu1 %vm1354_vm5, %v5976_v8 }
  0xfa   : > { %4679 = vmatmul.mubr.msk.f32.gmra.mrb[42].mxu0 %vm2448_vm6, %v3802_v45  ;;  %v5185_v0 = vtrunc.f32 %v443_v51  ;;  %v444_v45 = vadd.f32 0.5, %v6263_v24  ;;  %v5184_v48 = vcvt.f32.s32 %v5183_v29  ;;  %v5193_v22 = vtrunc.f32 %v447_v57  ;;  %4560 = vmatprep.mubr.msk.f32.mxu1 %vm1354_vm5, %v5999_v13 }
  0xfb   : > { %v725_v44 = vpop.permute.xlu1 %724  ;;  %4681 = vmatprep.mubr.msk.f32.mxu0 %vm2448_vm6, %v3803_v11  ;;  %v722_v34 = vpop.permute.xlu0 %721  ;;  %v6279_v11 = vld [vmem:[%s5394_s29 + $0x3d0] sm:$0xff]  ;;  %v5189_v25 = vtrunc.f32 %v445_v12 }
  0xfc   : > { %vm1012_vm11 = vcmp.eq.s32.totalorder %v5762_v53, %v722_v34  ;;  %916 = vperm.xlu1 %5247, %v5170_v41   ;;  %913 = vperm.xlu0 %5246, %v5168_v46   ;;  %vm1013_vm12 = vcmp.eq.s32.totalorder %v5762_v53, %v725_v44  ;;  %v5182_v46 = vcvt.f32.s32 %v5181_v21  ;;  %v5186_v16 = vcvt.f32.s32 %v5185_v0 }
  0xfd   : > { %v3805_v9 = vsel %vm1012_vm11, 1.0, %v5314_v42  ;;  %v3806_v19 = vsel %vm1013_vm12, 1.0, %v5314_v42  ;;  %v5187_v27 = vtrunc.f32 %v444_v45  ;;  %4561 = vmatmul.mubr.msk.f32.gmra.mrb[94].mxu1 %vm1354_vm5, %v5996_v17 }
  0xfe   : > { %4682 = vmatmul.mubr.msk.f32.gmra.mrb[44].mxu0 %vm2448_vm6, %v3804_v2  ;;  %v6296_v2 = vld [vmem:[%s5394_s29 + $0x3e8] sm:$0xff]  ;;  %4563 = vmatprep.mubr.msk.f32.mxu1 %vm1354_vm5, %v6019_v3 }
  0xff   : > { %v731_v52 = vpop.permute.xlu1 %730  ;;  %4684 = vmatprep.mubr.msk.f32.mxu0 %vm2448_vm6, %v3805_v9  ;;  %v728_v58 = vpop.permute.xlu0 %727  ;;  %v5188_v33 = vcvt.f32.s32 %v5187_v27 }
 0x100   : > { %vm1014_vm13 = vcmp.eq.s32.totalorder %v5762_v53, %v728_v58  ;;  %922 = vperm.xlu1 %5247, %v5174_v15   ;;  %919 = vperm.xlu0 %5246, %v5172_v36   ;;  %vm1015_vm14 = vcmp.eq.s32.totalorder %v5762_v53, %v731_v52  ;;  %v446_v36 = vadd.f32 0.5, %v6279_v11  ;;  %v6303_v58 = vld [vmem:[%s5394_s29 + $0x3e0] sm:$0xff] }
 0x101   : > { %v3807_v1 = vsel %vm1014_vm13, 1.0, %v5314_v42  ;;  %v3808_v44 = vsel %vm1015_vm14, 1.0, %v5314_v42  ;;  %v448_v8 = vadd.f32 0.5, %v6303_v58  ;;  %4564 = vmatmul.mubr.msk.f32.gmra.mrb[96].mxu1 %vm1354_vm5, %v6016_v32 }
 0x102   : > { %4685 = vmatmul.mubr.msk.f32.gmra.mrb[46].mxu0 %vm2448_vm6, %v3806_v19  ;;  %v5191_v51 = vtrunc.f32 %v446_v36  ;;  %4566 = vmatprep.mubr.msk.f32.mxu1 %vm1354_vm5, %v6043_v63 }
 0x103   : > { %v737_v49 = vpop.permute.xlu1 %736  ;;  %4687 = vmatprep.mubr.msk.f32.mxu0 %vm2448_vm6, %v3807_v1  ;;  %v734_v41 = vpop.permute.xlu0 %733  ;;  %v5195_v12 = vtrunc.f32 %v448_v8 }
 0x104   : > { %vm1016_vm15 = vcmp.eq.s32.totalorder %v5762_v53, %v734_v41  ;;  %928 = vperm.xlu1 %5247, %v5178_v40   ;;  %925 = vperm.xlu0 %5246, %v5176_v61   ;;  %vm1017_vm0 = vcmp.eq.s32.totalorder %v5762_v53, %v737_v49  ;;  %v449_v40 = vadd.f32 0.5, %v6296_v2  ;;  %v5190_v61 = vcvt.f32.s32 %v5189_v25  ;;  %v6320_v49 = vld [vmem:[%s5394_s29 + $0x3f8] sm:$0xff]  ;;  %v6323_v41 = vld [vmem:[%s5394_s29 + $0x3f0] sm:$0xff] }
 0x105   : > { %v3809_v34 = vsel %vm1016_vm15, 1.0, %v5314_v42  ;;  %v3810_v9 = vsel %vm1017_vm0, 1.0, %v5314_v42  ;;  %v5192_v0 = vcvt.f32.s32 %v5191_v51  ;;  %v451_v45 = vadd.f32 0.5, %v6320_v49  ;;  %4567 = vmatmul.mubr.msk.f32.gmra.mrb[98].mxu1 %vm1354_vm5, %v6040_v59 }
 0x106   : > { %4688 = vmatmul.mubr.msk.f32.gmra.mrb[48].mxu0 %vm2448_vm6, %v3808_v44  ;;  %v5197_v29 = vtrunc.f32 %v449_v40  ;;  %v450_v44 = vadd.f32 0.5, %v6323_v41  ;;  %4569 = vmatprep.mubr.msk.f32.mxu1 %vm1354_vm5, %v6063_v31 }
 0x107   : > { %v743_v38 = vpop.permute.xlu1 %742  ;;  %4690 = vmatprep.mubr.msk.f32.mxu0 %vm2448_vm6, %v3809_v34  ;;  %v740_v15 = vpop.permute.xlu0 %739  ;;  %v5201_v57 = vtrunc.f32 %v451_v45 }
 0x108   : > { %vm1018_vm1 = vcmp.eq.s32.totalorder %v5762_v53, %v740_v15  ;;  %934 = vperm.xlu1 %5247, %v5182_v46   ;;  %931 = vperm.xlu0 %5246, %v5180_v5   ;;  %vm1019_vm2 = vcmp.eq.s32.totalorder %v5762_v53, %v743_v38  ;;  %v5194_v5 = vcvt.f32.s32 %v5193_v22  ;;  %v5198_v15 = vcvt.f32.s32 %v5197_v29 }
 0x109   : > { %v3811_v52 = vsel %vm1018_vm1, 1.0, %v5314_v42  ;;  %v3812_v19 = vsel %vm1019_vm2, 1.0, %v5314_v42  ;;  %v5199_v36 = vtrunc.f32 %v450_v44  ;;  %v5202_v27 = vcvt.f32.s32 %v5201_v57  ;;  %4570 = vmatmul.mubr.msk.f32.gmra.mrb[100].mxu1 %vm1354_vm5, %v6056_v43 }
 0x10a   : > { %4691 = vmatmul.mubr.msk.f32.gmra.mrb[50].mxu0 %vm2448_vm6, %v3810_v9  ;;  %4572 = vmatprep.mubr.msk.f32.mxu1 %vm1354_vm5, %v6079_v30 }
 0x10b   : > { %v749_v4 = vpop.permute.xlu1 %748  ;;  %4693 = vmatprep.mubr.msk.f32.mxu0 %vm2448_vm6, %v3811_v52  ;;  %v746_v21 = vpop.permute.xlu0 %745  ;;  %v5200_v9 = vcvt.f32.s32 %v5199_v36 }
 0x10c   : > { %vm1020_vm3 = vcmp.eq.s32.totalorder %v5762_v53, %v746_v21  ;;  %940 = vperm.xlu1 %5247, %v5186_v16   ;;  %937 = vperm.xlu0 %5246, %v5184_v48   ;;  %vm1021_vm4 = vcmp.eq.s32.totalorder %v5762_v53, %v749_v4  ;;  %v5196_v16 = vcvt.f32.s32 %v5195_v12 }
 0x10d   : > { %v3813_v1 = vsel %vm1020_vm3, 1.0, %v5314_v42  ;;  %v3814_v17 = vsel %vm1021_vm4, 1.0, %v5314_v42  ;;  %4573 = vmatmul.mubr.msk.f32.gmra.mrb[102].mxu1 %vm1354_vm5, %v6076_v39 }
 0x10e   : > { %4694 = vmatmul.mubr.msk.f32.gmra.mrb[52].mxu0 %vm2448_vm6, %v3812_v19  ;;  %4575 = vmatprep.mubr.msk.f32.mxu1 %vm1354_vm5, %v6099_v35 }
 0x10f   : > { %v755_v13 = vpop.permute.xlu1 %754  ;;  %4696 = vmatprep.mubr.msk.f32.mxu0 %vm2448_vm6, %v3813_v1  ;;  %v752_v46 = vpop.permute.xlu0 %751 }
 0x110   : > { %vm1022_vm7 = vcmp.eq.s32.totalorder %v5762_v53, %v752_v46  ;;  %946 = vperm.xlu1 %5247, %v5190_v61   ;;  %943 = vperm.xlu0 %5246, %v5188_v33   ;;  %vm1023_vm8 = vcmp.eq.s32.totalorder %v5762_v53, %v755_v13 }
 0x111   : > { %v3815_v34 = vsel %vm1022_vm7, 1.0, %v5314_v42  ;;  %v3816_v48 = vsel %vm1023_vm8, 1.0, %v5314_v42  ;;  %4576 = vmatmul.mubr.msk.f32.gmra.mrb[104].mxu1 %vm1354_vm5, %v6096_v56 }
 0x112   : > { %4697 = vmatmul.mubr.msk.f32.gmra.mrb[54].mxu0 %vm2448_vm6, %v3814_v17  ;;  %4578 = vmatprep.mubr.msk.f32.mxu1 %vm1354_vm5, %v6123_v55 }
 0x113   : > { %v761_v3 = vpop.permute.xlu1 %760  ;;  %4699 = vmatprep.mubr.msk.f32.mxu0 %vm2448_vm6, %v3815_v34  ;;  %v758_v38 = vpop.permute.xlu0 %757 }
 0x114   : > { %vm1024_vm9 = vcmp.eq.s32.totalorder %v5762_v53, %v758_v38  ;;  %952 = vperm.xlu1 %5247, %v5194_v5   ;;  %949 = vperm.xlu0 %5246, %v5192_v0   ;;  %vm1025_vm10 = vcmp.eq.s32.totalorder %v5762_v53, %v761_v3  ;;  %v6389_v8 = vpop.f32.mrb[0].mxu1 }
 0x115   : > { %v3817_v25 = vsel %vm1024_vm9, 1.0, %v5314_v42  ;;  %v3818_v52 = vsel %vm1025_vm10, 1.0, %v5314_v42  ;;  %v6393_v56 = vpop.f32.mrb[1].mxu1  ;;  %4579 = vmatmul.mubr.msk.f32.gmra.mrb[106].mxu1 %vm1354_vm5, %v6116_v28 }
 0x116   : > { %4700 = vmatmul.mubr.msk.f32.gmra.mrb[56].mxu0 %vm2448_vm6, %v3816_v48  ;;  %4581 = vmatprep.mubr.msk.f32.mxu1 %vm1354_vm5, %v6143_v54 }
 0x117   : > { %v767_v32 = vpop.permute.xlu1 %766  ;;  %4702 = vmatprep.mubr.msk.f32.mxu0 %vm2448_vm6, %v3817_v25  ;;  %v764_v63 = vpop.permute.xlu0 %763 }
 0x118   : > { %vm1026_vm11 = vcmp.eq.s32.totalorder %v5762_v53, %v764_v63  ;;  %958 = vperm.xlu1 %5247, %v5198_v15   ;;  %955 = vperm.xlu0 %5246, %v5196_v16   ;;  %vm1027_vm12 = vcmp.eq.s32.totalorder %v5762_v53, %v767_v32  ;;  %v6403_v46 = vpop.f32.mrb[2].mxu1 }
 0x119   : > { %v3819_v4 = vsel %vm1026_vm11, 1.0, %v5314_v42  ;;  %v3820_v21 = vsel %vm1027_vm12, 1.0, %v5314_v42  ;;  %v6407_v28 = vpop.f32.mrb[3].mxu1  ;;  %4582 = vmatmul.mubr.msk.f32.gmra.mrb[108].mxu1 %vm1354_vm5, %v6140_v10 }
 0x11a   : > { %4703 = vmatmul.mubr.msk.f32.gmra.mrb[58].mxu0 %vm2448_vm6, %v3818_v52  ;;  %4584 = vmatprep.mubr.msk.f32.mxu1 %vm1354_vm5, %v6159_v14 }
 0x11b   : > { %v773_v59 = vpop.permute.xlu1 %772  ;;  %4705 = vmatprep.mubr.msk.f32.mxu0 %vm2448_vm6, %v3819_v4  ;;  %v770_v31 = vpop.permute.xlu0 %769 }
 0x11c   : > { %vm1028_vm13 = vcmp.eq.s32.totalorder %v5762_v53, %v770_v31  ;;  %964 = vperm.xlu1 %5247, %v5202_v27   ;;  %961 = vperm.xlu0 %5246, %v5200_v9   ;;  %vm1029_vm14 = vcmp.eq.s32.totalorder %v5762_v53, %v773_v59  ;;  %v6417_v12 = vpop.f32.mrb[4].mxu1 }
 0x11d   : > { %v3821_v22 = vsel %vm1028_vm13, 1.0, %v5314_v42  ;;  %v3822_v30 = vsel %vm1029_vm14, 1.0, %v5314_v42  ;;  %v6421_v10 = vpop.f32.mrb[5].mxu1  ;;  %4585 = vmatmul.mubr.msk.f32.gmra.mrb[110].mxu1 %vm1354_vm5, %v6156_v18 }
 0x11e   : > { %4706 = vmatmul.mubr.msk.f32.gmra.mrb[60].mxu0 %vm2448_vm6, %v3820_v21  ;;  %4587 = vmatprep.mubr.msk.f32.mxu1 %vm1354_vm5, %v6183_v20 }
 0x11f   : > { %v779_v43 = vpop.permute.xlu1 %778  ;;  %4708 = vmatprep.mubr.msk.f32.mxu0 %vm2448_vm6, %v3821_v22  ;;  %v776_v51 = vpop.permute.xlu0 %775 }
 0x120   : > { %vm1030_vm15 = vcmp.eq.s32.totalorder %v5762_v53, %v776_v51  ;;  %vm1031_vm0 = vcmp.eq.s32.totalorder %v5762_v53, %v779_v43  ;;  %v6431_v34 = vpop.f32.mrb[6].mxu1 }
 0x121   : > { %v3823_v40 = vsel %vm1030_vm15, 1.0, %v5314_v42  ;;  %v3824_v35 = vsel %vm1031_vm0, 1.0, %v5314_v42  ;;  %v6435_v18 = vpop.f32.mrb[7].mxu1  ;;  %4588 = vmatmul.mubr.msk.f32.gmra.mrb[112].mxu1 %vm1354_vm5, %v6176_v6 }
 0x122   : > { %4709 = vmatmul.mubr.msk.f32.gmra.mrb[62].mxu0 %vm2448_vm6, %v3822_v30  ;;  %4590 = vmatprep.mubr.msk.f32.mxu1 %vm1354_vm5, %v6203_v37 }
 0x123   : > { %v785_v39 = vpop.permute.xlu1 %784  ;;  %4711 = vmatprep.mubr.msk.f32.mxu0 %vm2448_vm6, %v3823_v40  ;;  %v782_v61 = vpop.permute.xlu0 %781 }
 0x124   : > { %vm1032_vm1 = vcmp.eq.s32.totalorder %v5762_v53, %v782_v61  ;;  %vm1033_vm2 = vcmp.eq.s32.totalorder %v5762_v53, %v785_v39  ;;  %v6445_v16 = vpop.f32.mrb[8].mxu1 }
 0x125   : > { %v3825_v33 = vsel %vm1032_vm1, 1.0, %v5314_v42  ;;  %v3826_v1 = vsel %vm1033_vm2, 1.0, %v5314_v42  ;;  %v6449_v6 = vpop.f32.mrb[9].mxu1  ;;  %4591 = vmatmul.mubr.msk.f32.gmra.mrb[114].mxu1 %vm1354_vm5, %v6200_v62 }
 0x126   : > { %4712 = vmatmul.mubr.msk.f32.gmra.mrb[64].mxu0 %vm2448_vm6, %v3824_v35  ;;  %4593 = vmatprep.mubr.msk.f32.mxu1 %vm1354_vm5, %v6219_v60 }
 0x127   : > { %v791_v19 = vpop.permute.xlu1 %790  ;;  %4714 = vmatprep.mubr.msk.f32.mxu0 %vm2448_vm6, %v3825_v33  ;;  %v788_v55 = vpop.permute.xlu0 %787 }
 0x128   : > { %vm1034_vm3 = vcmp.eq.s32.totalorder %v5762_v53, %v788_v55  ;;  %vm1035_vm4 = vcmp.eq.s32.totalorder %v5762_v53, %v791_v19  ;;  %v6459_v25 = vpop.f32.mrb[10].mxu1 }
 0x129   : > { %v3827_v13 = vsel %vm1034_vm3, 1.0, %v5314_v42  ;;  %v3828_v0 = vsel %vm1035_vm4, 1.0, %v5314_v42  ;;  %v6463_v62 = vpop.f32.mrb[11].mxu1  ;;  %4594 = vmatmul.mubr.msk.f32.gmra.mrb[116].mxu1 %vm1354_vm5, %v6216_v7 }
 0x12a   : > { %4715 = vmatmul.mubr.msk.f32.gmra.mrb[66].mxu0 %vm2448_vm6, %v3826_v1  ;;  %4596 = vmatprep.mubr.msk.f32.mxu1 %vm1354_vm5, %v6243_v23 }
 0x12b   : > { %v797_v5 = vpop.permute.xlu1 %796  ;;  %4717 = vmatprep.mubr.msk.f32.mxu0 %vm2448_vm6, %v3827_v13  ;;  %v794_v54 = vpop.permute.xlu0 %793 }
 0x12c   : > { %vm1036_vm7 = vcmp.eq.s32.totalorder %v5762_v53, %v794_v54  ;;  %vm1037_vm8 = vcmp.eq.s32.totalorder %v5762_v53, %v797_v5  ;;  %v6473_v9 = vpop.f32.mrb[12].mxu1 }
 0x12d   : > { %v3829_v29 = vsel %vm1036_vm7, 1.0, %v5314_v42  ;;  %v3830_v44 = vsel %vm1037_vm8, 1.0, %v5314_v42  ;;  %v6477_v7 = vpop.f32.mrb[13].mxu1  ;;  %4597 = vmatmul.mubr.msk.f32.gmra.mrb[118].mxu1 %vm1354_vm5, %v6236_v50 }
 0x12e   : > { %4718 = vmatmul.mubr.msk.f32.gmra.mrb[68].mxu0 %vm2448_vm6, %v3828_v0  ;;  %4599 = vmatprep.mubr.msk.f32.mxu1 %vm1354_vm5, %v6263_v24 }
 0x12f   : > { %v803_v45 = vpop.permute.xlu1 %802  ;;  %4720 = vmatprep.mubr.msk.f32.mxu0 %vm2448_vm6, %v3829_v29  ;;  %v800_v14 = vpop.permute.xlu0 %799 }
 0x130   : > { %vm1038_vm9 = vcmp.eq.s32.totalorder %v5762_v53, %v800_v14  ;;  %vm1039_vm10 = vcmp.eq.s32.totalorder %v5762_v53, %v803_v45  ;;  %v6487_v31 = vpop.f32.mrb[14].mxu1 }
 0x131   : > { %v3831_v17 = vsel %vm1038_vm9, 1.0, %v5314_v42  ;;  %v3832_v38 = vsel %vm1039_vm10, 1.0, %v5314_v42  ;;  %v6491_v50 = vpop.f32.mrb[15].mxu1  ;;  %4600 = vmatmul.mubr.msk.f32.gmra.mrb[120].mxu1 %vm1354_vm5, %v6260_v26 }
 0x132   : > { %4721 = vmatmul.mubr.msk.f32.gmra.mrb[70].mxu0 %vm2448_vm6, %v3830_v44  ;;  %4602 = vmatprep.mubr.msk.f32.mxu1 %vm1354_vm5, %v6279_v11 }
 0x133   : > { %v809_v3 = vpop.permute.xlu1 %808  ;;  %4723 = vmatprep.mubr.msk.f32.mxu0 %vm2448_vm6, %v3831_v17  ;;  %v806_v20 = vpop.permute.xlu0 %805 }
 0x134   : > { %vm1040_vm11 = vcmp.eq.s32.totalorder %v5762_v53, %v806_v20  ;;  %vm1041_vm12 = vcmp.eq.s32.totalorder %v5762_v53, %v809_v3  ;;  %v6501_v51 = vpop.f32.mrb[16].mxu1 }
 0x135   : > { %v3833_v15 = vsel %vm1040_vm11, 1.0, %v5314_v42  ;;  %v3834_v36 = vsel %vm1041_vm12, 1.0, %v5314_v42  ;;  %v6505_v26 = vpop.f32.mrb[17].mxu1  ;;  %4603 = vmatmul.mubr.msk.f32.gmra.mrb[122].mxu1 %vm1354_vm5, %v6276_v47 }
 0x136   : > { %4724 = vmatmul.mubr.msk.f32.gmra.mrb[72].mxu0 %vm2448_vm6, %v3832_v38  ;;  %4605 = vmatprep.mubr.msk.f32.mxu1 %vm1354_vm5, %v6303_v58 }
 0x137   : > { %v815_v57 = vpop.permute.xlu1 %814  ;;  %4726 = vmatprep.mubr.msk.f32.mxu0 %vm2448_vm6, %v3833_v15  ;;  %v812_v37 = vpop.permute.xlu0 %811 }
 0x138   : > { %vm1042_vm13 = vcmp.eq.s32.totalorder %v5762_v53, %v812_v37  ;;  %vm1043_vm14 = vcmp.eq.s32.totalorder %v5762_v53, %v815_v57  ;;  %v6515_v61 = vpop.f32.mrb[18].mxu1 }
 0x139   : > { %v3835_v48 = vsel %vm1042_vm13, 1.0, %v5314_v42  ;;  %v3836_v63 = vsel %vm1043_vm14, 1.0, %v5314_v42  ;;  %v6519_v47 = vpop.f32.mrb[19].mxu1  ;;  %4606 = vmatmul.mubr.msk.f32.gmra.mrb[124].mxu1 %vm1354_vm5, %v6296_v2 }
 0x13a   : > { %4727 = vmatmul.mubr.msk.f32.gmra.mrb[74].mxu0 %vm2448_vm6, %v3834_v36  ;;  %4608 = vmatprep.mubr.msk.f32.mxu1 %vm1354_vm5, %v6323_v41 }
 0x13b   : > { %v821_v32 = vpop.permute.xlu1 %820  ;;  %4729 = vmatprep.mubr.msk.f32.mxu0 %vm2448_vm6, %v3835_v48  ;;  %v818_v60 = vpop.permute.xlu0 %817 }
 0x13c   : > { %vm1044_vm15 = vcmp.eq.s32.totalorder %v5762_v53, %v818_v60  ;;  %vm1045_vm0 = vcmp.eq.s32.totalorder %v5762_v53, %v821_v32  ;;  %v6529_v55 = vpop.f32.mrb[20].mxu1 }
 0x13d   : > { %v3837_v27 = vsel %vm1044_vm15, 1.0, %v5314_v42  ;;  %v3838_v4 = vsel %vm1045_vm0, 1.0, %v5314_v42  ;;  %v6533_v2 = vpop.f32.mrb[21].mxu1  ;;  %4609 = vmatmul.mubr.msk.f32.gmra.mrb[126].mxu1 %vm1354_vm5, %v6320_v49 }
 0x13e   : > { %4730 = vmatmul.mubr.msk.f32.gmra.mrb[76].mxu0 %vm2448_vm6, %v3836_v63 }
 0x13f   : > { %v827_v52 = vpop.permute.xlu1 %826  ;;  %4732 = vmatprep.mubr.msk.f32.mxu0 %vm2448_vm6, %v3837_v27  ;;  %v824_v23 = vpop.permute.xlu0 %823 }
 0x140   : > { %vm1046_vm1 = vcmp.eq.s32.totalorder %v5762_v53, %v824_v23  ;;  %vm1047_vm2 = vcmp.eq.s32.totalorder %v5762_v53, %v827_v52  ;;  %v6541_v54 = vpop.f32.mrb[22].mxu1 }
 0x141   : > { %v3839_v59 = vsel %vm1046_vm1, 1.0, %v5314_v42  ;;  %v3840_v22 = vsel %vm1047_vm2, 1.0, %v5314_v42  ;;  %v6545_v0 = vpop.f32.mrb[23].mxu1 }
 0x142   : > { %4733 = vmatmul.mubr.msk.f32.gmra.mrb[78].mxu0 %vm2448_vm6, %v3838_v4 }
 0x143   : > { %v833_v21 = vpop.permute.xlu1 %832  ;;  %4735 = vmatprep.mubr.msk.f32.mxu0 %vm2448_vm6, %v3839_v59  ;;  %v830_v24 = vpop.permute.xlu0 %829 }
 0x144   : > { %vm1048_vm3 = vcmp.eq.s32.totalorder %v5762_v53, %v830_v24  ;;  %vm1049_vm4 = vcmp.eq.s32.totalorder %v5762_v53, %v833_v21  ;;  %v6551_v44 = vpop.f32.mrb[24].mxu1 }
 0x145   : > { %v3841_v43 = vsel %vm1048_vm3, 1.0, %v5314_v42  ;;  %v3842_v40 = vsel %vm1049_vm4, 1.0, %v5314_v42  ;;  %v6555_v17 = vpop.f32.mrb[25].mxu1 }
 0x146   : > { %4736 = vmatmul.mubr.msk.f32.gmra.mrb[80].mxu0 %vm2448_vm6, %v3840_v22 }
 0x147   : > { %v839_v30 = vpop.permute.xlu1 %838  ;;  %4738 = vmatprep.mubr.msk.f32.mxu0 %vm2448_vm6, %v3841_v43  ;;  %v836_v11 = vpop.permute.xlu0 %835 }
 0x148   : > { %vm1050_vm7 = vcmp.eq.s32.totalorder %v5762_v53, %v836_v11  ;;  %vm1051_vm8 = vcmp.eq.s32.totalorder %v5762_v53, %v839_v30  ;;  %v6561_v57 = vpop.f32.mrb[26].mxu1 }
 0x149   : > { %v3843_v39 = vsel %vm1050_vm7, 1.0, %v5314_v42  ;;  %v3844_v33 = vsel %vm1051_vm8, 1.0, %v5314_v42  ;;  %v6565_v37 = vpop.f32.mrb[27].mxu1 }
 0x14a   : > { %4739 = vmatmul.mubr.msk.f32.gmra.mrb[82].mxu0 %vm2448_vm6, %v3842_v40 }
 0x14b   : > { %v845_v35 = vpop.permute.xlu1 %844  ;;  %4741 = vmatprep.mubr.msk.f32.mxu0 %vm2448_vm6, %v3843_v39  ;;  %v842_v58 = vpop.permute.xlu0 %841 }
 0x14c   : > { %vm1052_vm9 = vcmp.eq.s32.totalorder %v5762_v53, %v842_v58  ;;  %vm1053_vm10 = vcmp.eq.s32.totalorder %v5762_v53, %v845_v35  ;;  %v6571_v63 = vpop.f32.mrb[28].mxu1 }
 0x14d   : > { %v3845_v19 = vsel %vm1052_vm9, 1.0, %v5314_v42  ;;  %v3846_v13 = vsel %vm1053_vm10, 1.0, %v5314_v42  ;;  %v6575_v27 = vpop.f32.mrb[29].mxu1 }
 0x14e   : > { %4742 = vmatmul.mubr.msk.f32.gmra.mrb[84].mxu0 %vm2448_vm6, %v3844_v33 }
 0x14f   : > { %v851_v1 = vpop.permute.xlu1 %850  ;;  %4744 = vmatprep.mubr.msk.f32.mxu0 %vm2448_vm6, %v3845_v19  ;;  %v848_v41 = vpop.permute.xlu0 %847 }
 0x150   : > { %vm1054_vm11 = vcmp.eq.s32.totalorder %v5762_v53, %v848_v41  ;;  %vm1055_vm12 = vcmp.eq.s32.totalorder %v5762_v53, %v851_v1  ;;  %v6581_v21 = vpop.f32.mrb[30].mxu1 }
 0x151   : > { %v3847_v5 = vsel %vm1054_vm11, 1.0, %v5314_v42  ;;  %v3848_v45 = vsel %vm1055_vm12, 1.0, %v5314_v42  ;;  %v6585_v24 = vpop.f32.mrb[31].mxu1 }
 0x152   : > { %4745 = vmatmul.mubr.msk.f32.gmra.mrb[86].mxu0 %vm2448_vm6, %v3846_v13 }
 0x153   : > { %v857_v29 = vpop.permute.xlu1 %856  ;;  %4747 = vmatprep.mubr.msk.f32.mxu0 %vm2448_vm6, %v3847_v5  ;;  %v854_v49 = vpop.permute.xlu0 %853 }
 0x154   : > { %vm1056_vm5 = vcmp.eq.s32.totalorder %v5762_v53, %v854_v49  ;;  %vm1057_vm13 = vcmp.eq.s32.totalorder %v5762_v53, %v857_v29  ;;  %v6591_v40 = vpop.f32.mrb[32].mxu1 }
 0x155   : > { %v3849_v14 = vsel %vm1056_vm5, 1.0, %v5314_v42  ;;  %v3850_v38 = vsel %vm1057_vm13, 1.0, %v5314_v42  ;;  %v6595_v39 = vpop.f32.mrb[33].mxu1 }
 0x156   : > { %4748 = vmatmul.mubr.msk.f32.gmra.mrb[88].mxu0 %vm2448_vm6, %v3848_v45 }
 0x157   : > { %v863_v3 = vpop.permute.xlu1 %862  ;;  %4750 = vmatprep.mubr.msk.f32.mxu0 %vm2448_vm6, %v3849_v14  ;;  %v860_v20 = vpop.permute.xlu0 %859 }
 0x158   : > { %vm1058_vm14 = vcmp.eq.s32.totalorder %v5762_v53, %v860_v20  ;;  %vm1059_vm15 = vcmp.eq.s32.totalorder %v5762_v53, %v863_v3  ;;  %v6601_v1 = vpop.f32.mrb[34].mxu1 }
 0x159   : > { %v3851_v15 = vsel %vm1058_vm14, 1.0, %v5314_v42  ;;  %v3852_v32 = vsel %vm1059_vm15, 1.0, %v5314_v42  ;;  %v6605_v41 = vpop.f32.mrb[35].mxu1 }
 0x15a   : > { %4751 = vmatmul.mubr.msk.f32.gmra.mrb[90].mxu0 %vm2448_vm6, %v3850_v38 }
 0x15b   : > { %v869_v36 = vpop.permute.xlu1 %868  ;;  %4753 = vmatprep.mubr.msk.f32.mxu0 %vm2448_vm6, %v3851_v15  ;;  %v866_v48 = vpop.permute.xlu0 %865 }
 0x15c   : > { %vm1060_vm0 = vcmp.eq.s32.totalorder %v5762_v53, %v866_v48  ;;  %vm1061_vm1 = vcmp.eq.s32.totalorder %v5762_v53, %v869_v36  ;;  %v6611_v45 = vpop.f32.mrb[36].mxu1 }
 0x15d   : > { %v3853_v60 = vsel %vm1060_vm0, 1.0, %v5314_v42  ;;  %v3854_v4 = vsel %vm1061_vm1, 1.0, %v5314_v42  ;;  %v6615_v14 = vpop.f32.mrb[37].mxu1 }
 0x15e   : > { %4754 = vmatmul.mubr.msk.f32.gmra.mrb[92].mxu0 %vm2448_vm6, %v3852_v32 }
 0x15f   : > { %v875_v52 = vpop.permute.xlu1 %874  ;;  %4756 = vmatprep.mubr.msk.f32.mxu0 %vm2448_vm6, %v3853_v60  ;;  %v872_v23 = vpop.permute.xlu0 %871 }
 0x160   : > { %vm1062_vm2 = vcmp.eq.s32.totalorder %v5762_v53, %v872_v23  ;;  %vm1063_vm3 = vcmp.eq.s32.totalorder %v5762_v53, %v875_v52  ;;  %v6621_v36 = vpop.f32.mrb[38].mxu1 }
 0x161   : > { %v3855_v59 = vsel %vm1062_vm2, 1.0, %v5314_v42  ;;  %v3856_v30 = vsel %vm1063_vm3, 1.0, %v5314_v42  ;;  %v6625_v48 = vpop.f32.mrb[39].mxu1 }
 0x162   : > { %4757 = vmatmul.mubr.msk.f32.gmra.mrb[94].mxu0 %vm2448_vm6, %v3854_v4 }
 0x163   : > { %v881_v22 = vpop.permute.xlu1 %880  ;;  %4759 = vmatprep.mubr.msk.f32.mxu0 %vm2448_vm6, %v3855_v59  ;;  %v878_v43 = vpop.permute.xlu0 %877 }
 0x164   : > { %vm1064_vm4 = vcmp.eq.s32.totalorder %v5762_v53, %v878_v43  ;;  %vm1065_vm7 = vcmp.eq.s32.totalorder %v5762_v53, %v881_v22  ;;  %v6632_v4 = vpop.f32.mrb[40].mxu1 }
 0x165   : > { %v3857_v11 = vsel %vm1064_vm4, 1.0, %v5314_v42  ;;  %v3858_v33 = vsel %vm1065_vm7, 1.0, %v5314_v42  ;;  %v6638_v59 = vpop.f32.mrb[41].mxu1 }
 0x166   : > { %4760 = vmatmul.mubr.msk.f32.gmra.mrb[96].mxu0 %vm2448_vm6, %v3856_v30 }
 0x167   : > { %v887_v35 = vpop.permute.xlu1 %886  ;;  %4762 = vmatprep.mubr.msk.f32.mxu0 %vm2448_vm6, %v3857_v11  ;;  %v884_v58 = vpop.permute.xlu0 %883 }
 0x168   : > { %vm1066_vm8 = vcmp.eq.s32.totalorder %v5762_v53, %v884_v58  ;;  %vm1067_vm9 = vcmp.eq.s32.totalorder %v5762_v53, %v887_v35  ;;  %v6644_v58 = vpop.f32.mrb[42].mxu1 }
 0x169   : > { %v3859_v19 = vsel %vm1066_vm8, 1.0, %v5314_v42  ;;  %v3860_v29 = vsel %vm1067_vm9, 1.0, %v5314_v42 }
 0x16a   : > { %4763 = vmatmul.mubr.msk.f32.gmra.mrb[98].mxu0 %vm2448_vm6, %v3858_v33 }
 0x16b   : > { %v893_v13 = vpop.permute.xlu1 %892  ;;  %4765 = vmatprep.mubr.msk.f32.mxu0 %vm2448_vm6, %v3859_v19  ;;  %v890_v5 = vpop.permute.xlu0 %889 }
 0x16c   : > { %vm1068_vm10 = vcmp.eq.s32.totalorder %v5762_v53, %v890_v5  ;;  %vm1069_vm11 = vcmp.eq.s32.totalorder %v5762_v53, %v893_v13  ;;  %v6649_v13 = vpop.f32.mrb[43].mxu1 }
 0x16d   : > { %v3861_v49 = vsel %vm1068_vm10, 1.0, %v5314_v42  ;;  %v3862_v38 = vsel %vm1069_vm11, 1.0, %v5314_v42 }
 0x16e   : > { %4766 = vmatmul.mubr.msk.f32.gmra.mrb[100].mxu0 %vm2448_vm6, %v3860_v29 }
 0x16f   : > { %v899_v3 = vpop.permute.xlu1 %898  ;;  %4768 = vmatprep.mubr.msk.f32.mxu0 %vm2448_vm6, %v3861_v49  ;;  %v896_v20 = vpop.permute.xlu0 %895 }
 0x170   : > { %vm1070_vm12 = vcmp.eq.s32.totalorder %v5762_v53, %v896_v20  ;;  %vm1071_vm5 = vcmp.eq.s32.totalorder %v5762_v53, %v899_v3 }
 0x171   : > { %v3863_v15 = vsel %vm1070_vm12, 1.0, %v5314_v42  ;;  %v3864_v52 = vsel %vm1071_vm5, 1.0, %v5314_v42 }
 0x172   : > { %4769 = vmatmul.mubr.msk.f32.gmra.mrb[102].mxu0 %vm2448_vm6, %v3862_v38 }
 0x173   : > { %v905_v32 = vpop.permute.xlu1 %904  ;;  %4771 = vmatprep.mubr.msk.f32.mxu0 %vm2448_vm6, %v3863_v15  ;;  %v902_v60 = vpop.permute.xlu0 %901 }
 0x174   : > { %vm1072_vm13 = vcmp.eq.s32.totalorder %v5762_v53, %v902_v60  ;;  %vm1073_vm14 = vcmp.eq.s32.totalorder %v5762_v53, %v905_v32 }
 0x175   : > { %v3865_v23 = vsel %vm1072_vm13, 1.0, %v5314_v42  ;;  %v3866_v30 = vsel %vm1073_vm14, 1.0, %v5314_v42 }
 0x176   : > { %4772 = vmatmul.mubr.msk.f32.gmra.mrb[104].mxu0 %vm2448_vm6, %v3864_v52 }
 0x177   : > { %v911_v22 = vpop.permute.xlu1 %910  ;;  %4774 = vmatprep.mubr.msk.f32.mxu0 %vm2448_vm6, %v3865_v23  ;;  %v908_v43 = vpop.permute.xlu0 %907 }
 0x178   : > { %vm1074_vm15 = vcmp.eq.s32.totalorder %v5762_v53, %v908_v43  ;;  %vm1075_vm0 = vcmp.eq.s32.totalorder %v5762_v53, %v911_v22 }
 0x179   : > { %v3867_v11 = vsel %vm1074_vm15, 1.0, %v5314_v42  ;;  %v4617_v35 = vpop.f32.mrb[0].mxu0 }
 0x17a   : > { %v2909_v33 = vadd.f32 %v4617_v35, %v6389_v8  ;;  %v2903_v19 = vpop.f32.mrb[1].mxu0  ;;  %4775 = vmatmul.mubr.msk.f32.gmra.mrb[106].mxu0 %vm2448_vm6, %v3866_v30  ;;  %v3868_v8 = vsel %vm1075_vm0, 1.0, %v5314_v42 }
 0x17b   : > { %v2904_v5 = vadd.f32 %v2903_v19, %v6393_v56  ;;  %v917_v29 = vpop.permute.xlu1 %916  ;;  %4777 = vmatprep.mubr.msk.f32.mxu0 %vm2448_vm6, %v3867_v11  ;;  %v914_v49 = vpop.permute.xlu0 %913 }
 0x17c   : > { %3543 = vst [vmem:[%s6653_s19 + $0x8] sm:$0xff] %v2909_v33  ;;  %vm1076_vm1 = vcmp.eq.s32.totalorder %v5762_v53, %v914_v49  ;;  %v6660_v56 = vpop.f32.mrb[44].mxu1  ;;  %vm1077_vm2 = vcmp.eq.s32.totalorder %v5762_v53, %v917_v29 }
 0x17d   : > { %3542 = vst [vmem:[%s6653_s19] sm:$0xff] %v2904_v5  ;;  %v3869_v3 = vsel %vm1076_vm1, 1.0, %v5314_v42  ;;  %v4620_v20 = vpop.f32.mrb[2].mxu0  ;;  %v6665_v32 = vpop.f32.mrb[45].mxu1  ;;  %v3870_v22 = vsel %vm1077_vm2, 1.0, %v5314_v42 }
 0x17e   : > { %v2919_v38 = vadd.f32 %v4620_v20, %v6403_v46  ;;  %v2913_v15 = vpop.f32.mrb[3].mxu0  ;;  %4778 = vmatmul.mubr.msk.f32.gmra.mrb[108].mxu0 %vm2448_vm6, %v3868_v8  ;;  %v6674_v30 = vpop.f32.mrb[46].mxu1 }
 0x17f   : > { %v2914_v60 = vadd.f32 %v2913_v15, %v6407_v28  ;;  %v923_v52 = vpop.permute.xlu1 %922  ;;  %4780 = vmatprep.mubr.msk.f32.mxu0 %vm2448_vm6, %v3869_v3  ;;  %v920_v23 = vpop.permute.xlu0 %919 }
 0x180   : > { %3545 = vst [vmem:[%s6653_s19 + $0x18] sm:$0xff] %v2919_v38  ;;  %vm1078_vm3 = vcmp.eq.s32.totalorder %v5762_v53, %v920_v23  ;;  %vm1079_vm4 = vcmp.eq.s32.totalorder %v5762_v53, %v923_v52  ;;  %v6679_v35 = vpop.f32.mrb[47].mxu1 }
 0x181   : > { %3544 = vst [vmem:[%s6653_s19 + $0x10] sm:$0xff] %v2914_v60  ;;  %v3871_v46 = vsel %vm1078_vm3, 1.0, %v5314_v42  ;;  %v4623_v43 = vpop.f32.mrb[4].mxu0  ;;  %v3872_v29 = vsel %vm1079_vm4, 1.0, %v5314_v42  ;;  %v6688_v8 = vpop.f32.mrb[48].mxu1 }
 0x182   : > { %v2929_v28 = vadd.f32 %v4623_v43, %v6417_v12  ;;  %v2923_v11 = vpop.f32.mrb[5].mxu0  ;;  %4781 = vmatmul.mubr.msk.f32.gmra.mrb[110].mxu0 %vm2448_vm6, %v3870_v22  ;;  %v6693_v20 = vpop.f32.mrb[49].mxu1 }
 0x183   : > { %v2924_v33 = vadd.f32 %v2923_v11, %v6421_v10  ;;  %v929_v19 = vpop.permute.xlu1 %928  ;;  %4783 = vmatprep.mubr.msk.f32.mxu0 %vm2448_vm6, %v3871_v46  ;;  %v926_v5 = vpop.permute.xlu0 %925 }
 0x184   : > { %3547 = vst [vmem:[%s6653_s19 + $0x28] sm:$0xff] %v2929_v28  ;;  %vm1080_vm7 = vcmp.eq.s32.totalorder %v5762_v53, %v926_v5  ;;  %vm1081_vm8 = vcmp.eq.s32.totalorder %v5762_v53, %v929_v19  ;;  %v6702_v22 = vpop.f32.mrb[50].mxu1 }
 0x185   : > { %3546 = vst [vmem:[%s6653_s19 + $0x20] sm:$0xff] %v2924_v33  ;;  %v3873_v12 = vsel %vm1080_vm7, 1.0, %v5314_v42  ;;  %v4626_v49 = vpop.f32.mrb[6].mxu0  ;;  %v3874_v52 = vsel %vm1081_vm8, 1.0, %v5314_v42  ;;  %v6707_v43 = vpop.f32.mrb[51].mxu1 }
 0x186   : > { %v2939_v10 = vadd.f32 %v4626_v49, %v6431_v34  ;;  %v2933_v3 = vpop.f32.mrb[7].mxu0  ;;  %4784 = vmatmul.mubr.msk.f32.gmra.mrb[112].mxu0 %vm2448_vm6, %v3872_v29  ;;  %v6716_v29 = vpop.f32.mrb[52].mxu1 }
 0x187   : > { %v2934_v38 = vadd.f32 %v2933_v3, %v6435_v18  ;;  %v935_v15 = vpop.permute.xlu1 %934  ;;  %4786 = vmatprep.mubr.msk.f32.mxu0 %vm2448_vm6, %v3873_v12  ;;  %v932_v60 = vpop.permute.xlu0 %931 }
 0x188   : > { %3549 = vst [vmem:[%s6653_s19 + $0x38] sm:$0xff] %v2939_v10  ;;  %vm1082_vm9 = vcmp.eq.s32.totalorder %v5762_v53, %v932_v60  ;;  %vm1083_vm10 = vcmp.eq.s32.totalorder %v5762_v53, %v935_v15  ;;  %v6721_v49 = vpop.f32.mrb[53].mxu1 }
 0x189   : > { %3548 = vst [vmem:[%s6653_s19 + $0x30] sm:$0xff] %v2934_v38  ;;  %v3875_v34 = vsel %vm1082_vm9, 1.0, %v5314_v42  ;;  %v4629_v23 = vpop.f32.mrb[8].mxu0  ;;  %v3876_v19 = vsel %vm1083_vm10, 1.0, %v5314_v42 }
 0x18a   : > { %v2949_v18 = vadd.f32 %v4629_v23, %v6445_v16  ;;  %v2943_v46 = vpop.f32.mrb[9].mxu0  ;;  %4787 = vmatmul.mubr.msk.f32.gmra.mrb[114].mxu0 %vm2448_vm6, %v3874_v52  ;;  %v6730_v52 = vpop.f32.mrb[54].mxu1 }
 0x18b   : > { %v2944_v28 = vadd.f32 %v2943_v46, %v6449_v6  ;;  %v941_v11 = vpop.permute.xlu1 %940  ;;  %4789 = vmatprep.mubr.msk.f32.mxu0 %vm2448_vm6, %v3875_v34  ;;  %v938_v33 = vpop.permute.xlu0 %937 }
 0x18c   : > { %3551 = vst [vmem:[%s6653_s19 + $0x48] sm:$0xff] %v2949_v18  ;;  %vm1084_vm11 = vcmp.eq.s32.totalorder %v5762_v53, %v938_v33  ;;  %vm1085_vm12 = vcmp.eq.s32.totalorder %v5762_v53, %v941_v11  ;;  %v6735_v23 = vpop.f32.mrb[55].mxu1 }
 0x18d   : > { %3550 = vst [vmem:[%s6653_s19 + $0x40] sm:$0xff] %v2944_v28  ;;  %v3877_v16 = vsel %vm1084_vm11, 1.0, %v5314_v42  ;;  %v4632_v5 = vpop.f32.mrb[10].mxu0  ;;  %v3878_v15 = vsel %vm1085_vm12, 1.0, %v5314_v42 }
 0x18e   : > { %v2959_v6 = vadd.f32 %v4632_v5, %v6459_v25  ;;  %v2953_v12 = vpop.f32.mrb[11].mxu0  ;;  %4790 = vmatmul.mubr.msk.f32.gmra.mrb[116].mxu0 %vm2448_vm6, %v3876_v19  ;;  %v6744_v19 = vpop.f32.mrb[56].mxu1 }
 0x18f   : > { %v2954_v10 = vadd.f32 %v2953_v12, %v6463_v62  ;;  %v947_v3 = vpop.permute.xlu1 %946  ;;  %4792 = vmatprep.mubr.msk.f32.mxu0 %vm2448_vm6, %v3877_v16  ;;  %v944_v38 = vpop.permute.xlu0 %943 }
 0x190   : > { %3553 = vst [vmem:[%s6653_s19 + $0x58] sm:$0xff] %v2959_v6  ;;  %vm1086_vm5 = vcmp.eq.s32.totalorder %v5762_v53, %v944_v38  ;;  %vm1087_vm13 = vcmp.eq.s32.totalorder %v5762_v53, %v947_v3  ;;  %v6749_v5 = vpop.f32.mrb[57].mxu1 }
 0x191   : > { %3552 = vst [vmem:[%s6653_s19 + $0x50] sm:$0xff] %v2954_v10  ;;  %v3879_v25 = vsel %vm1086_vm5, 1.0, %v5314_v42  ;;  %v4635_v60 = vpop.f32.mrb[12].mxu0  ;;  %v3880_v11 = vsel %vm1087_vm13, 1.0, %v5314_v42 }
 0x192   : > { %v2969_v62 = vadd.f32 %v4635_v60, %v6473_v9  ;;  %v2963_v34 = vpop.f32.mrb[13].mxu0  ;;  %4793 = vmatmul.mubr.msk.f32.gmra.mrb[118].mxu0 %vm2448_vm6, %v3878_v15  ;;  %v6758_v15 = vpop.f32.mrb[58].mxu1 }
 0x193   : > { %v2964_v18 = vadd.f32 %v2963_v34, %v6477_v7  ;;  %v953_v46 = vpop.permute.xlu1 %952  ;;  %4795 = vmatprep.mubr.msk.f32.mxu0 %vm2448_vm6, %v3879_v25  ;;  %v950_v28 = vpop.permute.xlu0 %949 }
 0x194   : > { %3555 = vst [vmem:[%s6653_s19 + $0x68] sm:$0xff] %v2969_v62  ;;  %vm1088_vm14 = vcmp.eq.s32.totalorder %v5762_v53, %v950_v28  ;;  %vm1089_vm15 = vcmp.eq.s32.totalorder %v5762_v53, %v953_v46  ;;  %v6763_v60 = vpop.f32.mrb[59].mxu1 }
 0x195   : > { %3554 = vst [vmem:[%s6653_s19 + $0x60] sm:$0xff] %v2964_v18  ;;  %v3881_v9 = vsel %vm1088_vm14, 1.0, %v5314_v42  ;;  %v4638_v33 = vpop.f32.mrb[14].mxu0  ;;  %v3882_v3 = vsel %vm1089_vm15, 1.0, %v5314_v42 }
 0x196   : > { %v2979_v7 = vadd.f32 %v4638_v33, %v6487_v31  ;;  %v2973_v16 = vpop.f32.mrb[15].mxu0  ;;  %4796 = vmatmul.mubr.msk.f32.gmra.mrb[120].mxu0 %vm2448_vm6, %v3880_v11  ;;  %v6772_v11 = vpop.f32.mrb[60].mxu1 }
 0x197   : > { %v2974_v6 = vadd.f32 %v2973_v16, %v6491_v50  ;;  %v959_v12 = vpop.permute.xlu1 %958  ;;  %4798 = vmatprep.mubr.msk.f32.mxu0 %vm2448_vm6, %v3881_v9  ;;  %v956_v10 = vpop.permute.xlu0 %955 }
 0x198   : > { %3557 = vst [vmem:[%s6653_s19 + $0x78] sm:$0xff] %v2979_v7  ;;  %vm1090_vm0 = vcmp.eq.s32.totalorder %v5762_v53, %v956_v10  ;;  %vm1091_vm1 = vcmp.eq.s32.totalorder %v5762_v53, %v959_v12  ;;  %v6777_v33 = vpop.f32.mrb[61].mxu1 }
 0x199   : > { %3556 = vst [vmem:[%s6653_s19 + $0x70] sm:$0xff] %v2974_v6  ;;  %v3883_v31 = vsel %vm1090_vm0, 1.0, %v5314_v42  ;;  %v4641_v38 = vpop.f32.mrb[16].mxu0  ;;  %v3884_v46 = vsel %vm1091_vm1, 1.0, %v5314_v42 }
 0x19a   : > { %v2989_v50 = vadd.f32 %v4641_v38, %v6501_v51  ;;  %v2983_v25 = vpop.f32.mrb[17].mxu0  ;;  %4799 = vmatmul.mubr.msk.f32.gmra.mrb[122].mxu0 %vm2448_vm6, %v3882_v3 }
 0x19b   : > { %v2984_v62 = vadd.f32 %v2983_v25, %v6505_v26  ;;  %v965_v34 = vpop.permute.xlu1 %964  ;;  %4801 = vmatprep.mubr.msk.f32.mxu0 %vm2448_vm6, %v3883_v31  ;;  %v962_v18 = vpop.permute.xlu0 %961 }
 0x19c   : > { %3559 = vst [vmem:[%s6653_s19 + $0x88] sm:$0xff] %v2989_v50  ;;  %vm1092_vm2 = vcmp.eq.s32.totalorder %v5762_v53, %v962_v18  ;;  %vm1093_vm3 = vcmp.eq.s32.totalorder %v5762_v53, %v965_v34  ;;  %v6784_v53 = vpop.f32.mrb[62].mxu1 }
 0x19d   : > { %3558 = vst [vmem:[%s6653_s19 + $0x80] sm:$0xff] %v2984_v62  ;;  %v3885_v51 = vsel %vm1092_vm2, 1.0, %v5314_v42  ;;  %v4644_v28 = vpop.f32.mrb[18].mxu0  ;;  %v3886_v16 = vsel %vm1093_vm3, 1.0, %v5314_v42  ;;  %v6788_v10 = vpop.f32.mrb[63].mxu1 }
 0x19e   : > { %v2999_v26 = vadd.f32 %v4644_v28, %v6515_v61  ;;  %v2993_v9 = vpop.f32.mrb[19].mxu0  ;;  %4802 = vmatmul.mubr.msk.f32.gmra.mrb[124].mxu0 %vm2448_vm6, %v3884_v46  ;;  %v6793_v3 = vpop.f32.mrb[64].mxu1 }
 0x19f   : > { %v2994_v7 = vadd.f32 %v2993_v9, %v6519_v47  ;;  %4804 = vmatprep.mubr.msk.f32.mxu0 %vm2448_vm6, %v3885_v51  ;;  %v6796_v50 = vpop.f32.mrb[65].mxu1 }
 0x1a0   : > { %3561 = vst [vmem:[%s6653_s19 + $0x98] sm:$0xff] %v2999_v26 }
 0x1a1   : > { %3560 = vst [vmem:[%s6653_s19 + $0x90] sm:$0xff] %v2994_v7  ;;  %v4647_v6 = vpop.f32.mrb[20].mxu0 }
 0x1a2   : > { %v3009_v61 = vadd.f32 %v4647_v6, %v6529_v55  ;;  %v3003_v12 = vpop.f32.mrb[21].mxu0  ;;  %4805 = vmatmul.mubr.msk.f32.gmra.mrb[126].mxu0 %vm2448_vm6, %v3886_v16 }
 0x1a3   : > { %v3004_v47 = vadd.f32 %v3003_v12, %v6533_v2  ;;  %v6801_v2 = vpop.f32.mrb[66].mxu1 }
 0x1a4   : > { %3563 = vst [vmem:[%s6653_s19 + $0xa8] sm:$0xff] %v3009_v61  ;;  %v6804_v18 = vpop.f32.mrb[67].mxu1 }
 0x1a5   : > { %3562 = vst [vmem:[%s6653_s19 + $0xa0] sm:$0xff] %v3004_v47  ;;  %v4650_v42 = vpop.f32.mrb[22].mxu0 }
 0x1a6   : > { %v3019_v31 = vadd.f32 %v4650_v42, %v6541_v54  ;;  %v3013_v38 = vpop.f32.mrb[23].mxu0 }
 0x1a7   : > { %v3014_v55 = vadd.f32 %v3013_v38, %v6545_v0  ;;  %v6809_v0 = vpop.f32.mrb[68].mxu1 }
 0x1a8   : > { %3565 = vst [vmem:[%s6653_s19 + $0xb8] sm:$0xff] %v3019_v31  ;;  %v6812_v26 = vpop.f32.mrb[69].mxu1 }
 0x1a9   : > { %3564 = vst [vmem:[%s6653_s19 + $0xb0] sm:$0xff] %v3014_v55  ;;  %v4653_v25 = vpop.f32.mrb[24].mxu0 }
 0x1aa   : > { %v3029_v62 = vadd.f32 %v4653_v25, %v6551_v44  ;;  %v3023_v34 = vpop.f32.mrb[25].mxu0 }
 0x1ab   : > { %v3024_v46 = vadd.f32 %v3023_v34, %v6555_v17  ;;  %v6817_v17 = vpop.f32.mrb[70].mxu1 }
 0x1ac   : > { %3567 = vst [vmem:[%s6653_s19 + $0xc8] sm:$0xff] %v3029_v62  ;;  %v6820_v6 = vpop.f32.mrb[71].mxu1 }
 0x1ad   : > { %3566 = vst [vmem:[%s6653_s19 + $0xc0] sm:$0xff] %v3024_v46  ;;  %v4656_v54 = vpop.f32.mrb[26].mxu0 }
 0x1ae   : > { %v3039_v51 = vadd.f32 %v4656_v54, %v6561_v57  ;;  %v3033_v28 = vpop.f32.mrb[27].mxu0 }
 0x1af   : > { %v3034_v9 = vadd.f32 %v3033_v28, %v6565_v37  ;;  %v6825_v37 = vpop.f32.mrb[72].mxu1 }
 0x1b0   : > { %3569 = vst [vmem:[%s6653_s19 + $0xd8] sm:$0xff] %v3039_v51  ;;  %v6828_v42 = vpop.f32.mrb[73].mxu1 }
 0x1b1   : > { %3568 = vst [vmem:[%s6653_s19 + $0xd0] sm:$0xff] %v3034_v9  ;;  %v4659_v44 = vpop.f32.mrb[28].mxu0 }
 0x1b2   : > { %v3049_v7 = vadd.f32 %v4659_v44, %v6571_v63  ;;  %v3043_v16 = vpop.f32.mrb[29].mxu0 }
 0x1b3   : > { %v3044_v61 = vadd.f32 %v3043_v16, %v6575_v27  ;;  %v6833_v27 = vpop.f32.mrb[74].mxu1 }
 0x1b4   : > { %3571 = vst [vmem:[%s6653_s19 + $0xe8] sm:$0xff] %v3049_v7  ;;  %v6836_v25 = vpop.f32.mrb[75].mxu1 }
 0x1b5   : > { %3570 = vst [vmem:[%s6653_s19 + $0xe0] sm:$0xff] %v3044_v61  ;;  %v4662_v57 = vpop.f32.mrb[30].mxu0 }
 0x1b6   : > { %v3059_v12 = vadd.f32 %v4662_v57, %v6581_v21  ;;  %v3053_v47 = vpop.f32.mrb[31].mxu0 }
 0x1b7   : > { %v3054_v31 = vadd.f32 %v3053_v47, %v6585_v24  ;;  %v6841_v24 = vpop.f32.mrb[76].mxu1 }
 0x1b8   : > { %3573 = vst [vmem:[%s6653_s19 + $0xf8] sm:$0xff] %v3059_v12  ;;  %v6844_v54 = vpop.f32.mrb[77].mxu1 }
 0x1b9   : > { %3572 = vst [vmem:[%s6653_s19 + $0xf0] sm:$0xff] %v3054_v31  ;;  %v4665_v63 = vpop.f32.mrb[32].mxu0 }
 0x1ba   : > { %v3069_v38 = vadd.f32 %v4665_v63, %v6591_v40  ;;  %v3063_v55 = vpop.f32.mrb[33].mxu0 }
 0x1bb   : > { %v3064_v62 = vadd.f32 %v3063_v55, %v6595_v39  ;;  %v6849_v39 = vpop.f32.mrb[78].mxu1 }
 0x1bc   : > { %3575 = vst [vmem:[%s6653_s19 + $0x108] sm:$0xff] %v3069_v38  ;;  %v6852_v44 = vpop.f32.mrb[79].mxu1 }
 0x1bd   : > { %3574 = vst [vmem:[%s6653_s19 + $0x100] sm:$0xff] %v3064_v62  ;;  %v4668_v21 = vpop.f32.mrb[34].mxu0 }
 0x1be   : > { %v3079_v34 = vadd.f32 %v4668_v21, %v6601_v1  ;;  %v3073_v46 = vpop.f32.mrb[35].mxu0 }
 0x1bf   : > { %v3074_v51 = vadd.f32 %v3073_v46, %v6605_v41  ;;  %v6857_v41 = vpop.f32.mrb[80].mxu1 }
 0x1c0   : > { %3577 = vst [vmem:[%s6653_s19 + $0x118] sm:$0xff] %v3079_v34  ;;  %v6860_v57 = vpop.f32.mrb[81].mxu1 }
 0x1c1   : > { %3576 = vst [vmem:[%s6653_s19 + $0x110] sm:$0xff] %v3074_v51  ;;  %v4671_v40 = vpop.f32.mrb[36].mxu0 }
 0x1c2   : > { %v3089_v28 = vadd.f32 %v4671_v40, %v6611_v45  ;;  %v3083_v9 = vpop.f32.mrb[37].mxu0 }
 0x1c3   : > { %v3084_v7 = vadd.f32 %v3083_v9, %v6615_v14  ;;  %v6865_v14 = vpop.f32.mrb[82].mxu1 }
 0x1c4   : > { %3579 = vst [vmem:[%s6653_s19 + $0x128] sm:$0xff] %v3089_v28  ;;  %v6868_v63 = vpop.f32.mrb[83].mxu1 }
 0x1c5   : > { %3578 = vst [vmem:[%s6653_s19 + $0x120] sm:$0xff] %v3084_v7  ;;  %v4674_v1 = vpop.f32.mrb[38].mxu0 }
 0x1c6   : > { %v3099_v16 = vadd.f32 %v4674_v1, %v6621_v36  ;;  %v3093_v61 = vpop.f32.mrb[39].mxu0 }
 0x1c7   : > { %v3094_v12 = vadd.f32 %v3093_v61, %v6625_v48  ;;  %v6873_v48 = vpop.f32.mrb[84].mxu1 }
 0x1c8   : > { %3581 = vst [vmem:[%s6653_s19 + $0x138] sm:$0xff] %v3099_v16  ;;  %v6876_v21 = vpop.f32.mrb[85].mxu1 }
 0x1c9   : > { %3580 = vst [vmem:[%s6653_s19 + $0x130] sm:$0xff] %v3094_v12  ;;  %v4677_v45 = vpop.f32.mrb[40].mxu0 }
 0x1ca   : > { %v3109_v47 = vadd.f32 %v4677_v45, %v6632_v4  ;;  %v3103_v31 = vpop.f32.mrb[41].mxu0 }
 0x1cb   : > { %v3104_v38 = vadd.f32 %v3103_v31, %v6638_v59  ;;  %v6881_v59 = vpop.f32.mrb[86].mxu1 }
 0x1cc   : > { %3583 = vst [vmem:[%s6653_s19 + $0x148] sm:$0xff] %v3109_v47  ;;  %v6884_v40 = vpop.f32.mrb[87].mxu1 }
 0x1cd   : > { %3582 = vst [vmem:[%s6653_s19 + $0x140] sm:$0xff] %v3104_v38  ;;  %v4680_v36 = vpop.f32.mrb[42].mxu0 }
 0x1ce   : > { %v3119_v55 = vadd.f32 %v4680_v36, %v6644_v58  ;;  %v3113_v62 = vpop.f32.mrb[43].mxu0 }
 0x1cf   : > { %v3114_v34 = vadd.f32 %v3113_v62, %v6649_v13  ;;  %v6889_v13 = vpop.f32.mrb[88].mxu1 }
 0x1d0   : > { %3585 = vst [vmem:[%s6653_s19 + $0x158] sm:$0xff] %v3119_v55  ;;  %v6892_v1 = vpop.f32.mrb[89].mxu1 }
 0x1d1   : > { %3584 = vst [vmem:[%s6653_s19 + $0x150] sm:$0xff] %v3114_v34  ;;  %v4683_v4 = vpop.f32.mrb[44].mxu0 }
 0x1d2   : > { %v3129_v46 = vadd.f32 %v4683_v4, %v6660_v56  ;;  %v3123_v51 = vpop.f32.mrb[45].mxu0 }
 0x1d3   : > { %v3124_v28 = vadd.f32 %v3123_v51, %v6665_v32  ;;  %v6897_v32 = vpop.f32.mrb[90].mxu1 }
 0x1d4   : > { %3587 = vst [vmem:[%s6653_s19 + $0x168] sm:$0xff] %v3129_v46  ;;  %v6900_v45 = vpop.f32.mrb[91].mxu1 }
 0x1d5   : > { %3586 = vst [vmem:[%s6653_s19 + $0x160] sm:$0xff] %v3124_v28  ;;  %v4686_v58 = vpop.f32.mrb[46].mxu0 }
 0x1d6   : > { %v3139_v9 = vadd.f32 %v4686_v58, %v6674_v30  ;;  %v3133_v7 = vpop.f32.mrb[47].mxu0 }
 0x1d7   : > { %v3134_v16 = vadd.f32 %v3133_v7, %v6679_v35  ;;  %v6905_v35 = vpop.f32.mrb[92].mxu1 }
 0x1d8   : > { %3589 = vst [vmem:[%s6653_s19 + $0x178] sm:$0xff] %v3139_v9  ;;  %v6908_v36 = vpop.f32.mrb[93].mxu1 }
 0x1d9   : > { %3588 = vst [vmem:[%s6653_s19 + $0x170] sm:$0xff] %v3134_v16  ;;  %v4689_v56 = vpop.f32.mrb[48].mxu0 }
 0x1da   : > { %v3149_v61 = vadd.f32 %v4689_v56, %v6688_v8  ;;  %v3143_v12 = vpop.f32.mrb[49].mxu0 }
 0x1db   : > { %v3144_v47 = vadd.f32 %v3143_v12, %v6693_v20  ;;  %v6913_v20 = vpop.f32.mrb[94].mxu1 }
 0x1dc   : > { %3591 = vst [vmem:[%s6653_s19 + $0x188] sm:$0xff] %v3149_v61  ;;  %v6916_v4 = vpop.f32.mrb[95].mxu1 }
 0x1dd   : > { %3590 = vst [vmem:[%s6653_s19 + $0x180] sm:$0xff] %v3144_v47  ;;  %v4692_v30 = vpop.f32.mrb[50].mxu0 }
 0x1de   : > { %v3159_v31 = vadd.f32 %v4692_v30, %v6702_v22  ;;  %v3153_v38 = vpop.f32.mrb[51].mxu0 }
 0x1df   : > { %v3154_v55 = vadd.f32 %v3153_v38, %v6707_v43  ;;  %v6921_v43 = vpop.f32.mrb[96].mxu1 }
 0x1e0   : > { %3593 = vst [vmem:[%s6653_s19 + $0x198] sm:$0xff] %v3159_v31  ;;  %v6924_v58 = vpop.f32.mrb[97].mxu1 }
 0x1e1   : > { %3592 = vst [vmem:[%s6653_s19 + $0x190] sm:$0xff] %v3154_v55  ;;  %v4695_v8 = vpop.f32.mrb[52].mxu0 }
 0x1e2   : > { %v3169_v62 = vadd.f32 %v4695_v8, %v6716_v29  ;;  %v3163_v34 = vpop.f32.mrb[53].mxu0 }
 0x1e3   : > { %v3164_v46 = vadd.f32 %v3163_v34, %v6721_v49  ;;  %v6929_v49 = vpop.f32.mrb[98].mxu1 }
 0x1e4   : > { %3595 = vst [vmem:[%s6653_s19 + $0x1a8] sm:$0xff] %v3169_v62  ;;  %v6932_v56 = vpop.f32.mrb[99].mxu1 }
 0x1e5   : > { %3594 = vst [vmem:[%s6653_s19 + $0x1a0] sm:$0xff] %v3164_v46  ;;  %v4698_v22 = vpop.f32.mrb[54].mxu0 }
 0x1e6   : > { %v3179_v51 = vadd.f32 %v4698_v22, %v6730_v52  ;;  %v3173_v28 = vpop.f32.mrb[55].mxu0 }
 0x1e7   : > { %v3174_v9 = vadd.f32 %v3173_v28, %v6735_v23  ;;  %v6937_v23 = vpop.f32.mrb[100].mxu1 }
 0x1e8   : > { %3597 = vst [vmem:[%s6653_s19 + $0x1b8] sm:$0xff] %v3179_v51  ;;  %v6940_v30 = vpop.f32.mrb[101].mxu1 }
 0x1e9   : > { %3596 = vst [vmem:[%s6653_s19 + $0x1b0] sm:$0xff] %v3174_v9  ;;  %v4701_v29 = vpop.f32.mrb[56].mxu0 }
 0x1ea   : > { %v3189_v7 = vadd.f32 %v4701_v29, %v6744_v19  ;;  %v3183_v16 = vpop.f32.mrb[57].mxu0 }
 0x1eb   : > { %v3184_v61 = vadd.f32 %v3183_v16, %v6749_v5  ;;  %v6945_v5 = vpop.f32.mrb[102].mxu1 }
 0x1ec   : > { %3599 = vst [vmem:[%s6653_s19 + $0x1c8] sm:$0xff] %v3189_v7  ;;  %v6948_v8 = vpop.f32.mrb[103].mxu1 }
 0x1ed   : > { %3598 = vst [vmem:[%s6653_s19 + $0x1c0] sm:$0xff] %v3184_v61  ;;  %v4704_v52 = vpop.f32.mrb[58].mxu0 }
 0x1ee   : > { %v3199_v12 = vadd.f32 %v4704_v52, %v6758_v15  ;;  %v3193_v47 = vpop.f32.mrb[59].mxu0 }
 0x1ef   : > { %v3194_v31 = vadd.f32 %v3193_v47, %v6763_v60  ;;  %v6953_v60 = vpop.f32.mrb[104].mxu1 }
 0x1f0   : > { %3601 = vst [vmem:[%s6653_s19 + $0x1d8] sm:$0xff] %v3199_v12  ;;  %v6956_v22 = vpop.f32.mrb[105].mxu1 }
 0x1f1   : > { %3600 = vst [vmem:[%s6653_s19 + $0x1d0] sm:$0xff] %v3194_v31  ;;  %v4707_v19 = vpop.f32.mrb[60].mxu0 }
 0x1f2   : > { %v3209_v38 = vadd.f32 %v4707_v19, %v6772_v11  ;;  %v3203_v55 = vpop.f32.mrb[61].mxu0 }
 0x1f3   : > { %v3204_v62 = vadd.f32 %v3203_v55, %v6777_v33  ;;  %v6961_v33 = vpop.f32.mrb[106].mxu1 }
 0x1f4   : > { %3603 = vst [vmem:[%s6653_s19 + $0x1e8] sm:$0xff] %v3209_v38  ;;  %v6964_v29 = vpop.f32.mrb[107].mxu1 }
 0x1f5   : > { %3602 = vst [vmem:[%s6653_s19 + $0x1e0] sm:$0xff] %v3204_v62  ;;  %v4710_v15 = vpop.f32.mrb[62].mxu0 }
 0x1f6   : > { %v3219_v34 = vadd.f32 %v4710_v15, %v6784_v53  ;;  %v3213_v46 = vpop.f32.mrb[63].mxu0 }
 0x1f7   : > { %v3214_v51 = vadd.f32 %v3213_v46, %v6788_v10  ;;  %v6969_v10 = vpop.f32.mrb[108].mxu1 }
 0x1f8   : > { %3605 = vst [vmem:[%s6653_s19 + $0x1f8] sm:$0xff] %v3219_v34  ;;  %v6972_v52 = vpop.f32.mrb[109].mxu1 }
 0x1f9   : > { %3604 = vst [vmem:[%s6653_s19 + $0x1f0] sm:$0xff] %v3214_v51  ;;  %v4713_v11 = vpop.f32.mrb[64].mxu0 }
 0x1fa   : > { %v3229_v28 = vadd.f32 %v4713_v11, %v6793_v3  ;;  %v3223_v9 = vpop.f32.mrb[65].mxu0 }
 0x1fb   : > { %v3224_v7 = vadd.f32 %v3223_v9, %v6796_v50  ;;  %v6977_v50 = vpop.f32.mrb[110].mxu1 }
 0x1fc   : > { %3607 = vst [vmem:[%s6653_s19 + $0x208] sm:$0xff] %v3229_v28  ;;  %v6980_v19 = vpop.f32.mrb[111].mxu1 }
 0x1fd   : > { %3606 = vst [vmem:[%s6653_s19 + $0x200] sm:$0xff] %v3224_v7  ;;  %v4716_v53 = vpop.f32.mrb[66].mxu0 }
 0x1fe   : > { %v3239_v16 = vadd.f32 %v4716_v53, %v6801_v2  ;;  %v3233_v61 = vpop.f32.mrb[67].mxu0 }
 0x1ff   : > { %v3234_v12 = vadd.f32 %v3233_v61, %v6804_v18  ;;  %v6985_v18 = vpop.f32.mrb[112].mxu1 }
 0x200   : > { %3609 = vst [vmem:[%s6653_s19 + $0x218] sm:$0xff] %v3239_v16  ;;  %v6988_v15 = vpop.f32.mrb[113].mxu1 }
 0x201   : > { %3608 = vst [vmem:[%s6653_s19 + $0x210] sm:$0xff] %v3234_v12  ;;  %v4719_v3 = vpop.f32.mrb[68].mxu0 }
 0x202   : > { %v3249_v47 = vadd.f32 %v4719_v3, %v6809_v0  ;;  %v3243_v31 = vpop.f32.mrb[69].mxu0 }
 0x203   : > { %v3244_v38 = vadd.f32 %v3243_v31, %v6812_v26  ;;  %v6993_v26 = vpop.f32.mrb[114].mxu1 }
 0x204   : > { %3611 = vst [vmem:[%s6653_s19 + $0x228] sm:$0xff] %v3249_v47  ;;  %v6996_v11 = vpop.f32.mrb[115].mxu1 }
 0x205   : > { %3610 = vst [vmem:[%s6653_s19 + $0x220] sm:$0xff] %v3244_v38  ;;  %v4722_v2 = vpop.f32.mrb[70].mxu0 }
 0x206   : > { %v3259_v55 = vadd.f32 %v4722_v2, %v6817_v17  ;;  %v3253_v62 = vpop.f32.mrb[71].mxu0 }
 0x207   : > { %v3254_v34 = vadd.f32 %v3253_v62, %v6820_v6  ;;  %v7001_v6 = vpop.f32.mrb[116].mxu1 }
 0x208   : > { %3613 = vst [vmem:[%s6653_s19 + $0x238] sm:$0xff] %v3259_v55  ;;  %v7004_v53 = vpop.f32.mrb[117].mxu1 }
 0x209   : > { %3612 = vst [vmem:[%s6653_s19 + $0x230] sm:$0xff] %v3254_v34  ;;  %v4725_v0 = vpop.f32.mrb[72].mxu0 }
 0x20a   : > { %v3269_v46 = vadd.f32 %v4725_v0, %v6825_v37  ;;  %v3263_v51 = vpop.f32.mrb[73].mxu0 }
 0x20b   : > { %v3264_v28 = vadd.f32 %v3263_v51, %v6828_v42  ;;  %v7009_v42 = vpop.f32.mrb[118].mxu1 }
 0x20c   : > { %3615 = vst [vmem:[%s6653_s19 + $0x248] sm:$0xff] %v3269_v46  ;;  %v7012_v3 = vpop.f32.mrb[119].mxu1 }
 0x20d   : > { %3614 = vst [vmem:[%s6653_s19 + $0x240] sm:$0xff] %v3264_v28  ;;  %v4728_v17 = vpop.f32.mrb[74].mxu0 }
 0x20e   : > { %v3279_v9 = vadd.f32 %v4728_v17, %v6833_v27  ;;  %v3273_v7 = vpop.f32.mrb[75].mxu0 }
 0x20f   : > { %v3274_v16 = vadd.f32 %v3273_v7, %v6836_v25  ;;  %v7017_v25 = vpop.f32.mrb[120].mxu1 }
 0x210   : > { %3617 = vst [vmem:[%s6653_s19 + $0x258] sm:$0xff] %v3279_v9  ;;  %v7020_v2 = vpop.f32.mrb[121].mxu1 }
 0x211   : > { %3616 = vst [vmem:[%s6653_s19 + $0x250] sm:$0xff] %v3274_v16  ;;  %v4731_v37 = vpop.f32.mrb[76].mxu0 }
 0x212   : > { %v3289_v61 = vadd.f32 %v4731_v37, %v6841_v24  ;;  %v3283_v12 = vpop.f32.mrb[77].mxu0 }
 0x213   : > { %v3284_v47 = vadd.f32 %v3283_v12, %v6844_v54  ;;  %v7025_v54 = vpop.f32.mrb[122].mxu1 }
 0x214   : > { %3619 = vst [vmem:[%s6653_s19 + $0x268] sm:$0xff] %v3289_v61  ;;  %v7028_v0 = vpop.f32.mrb[123].mxu1 }
 0x215   : > { %3618 = vst [vmem:[%s6653_s19 + $0x260] sm:$0xff] %v3284_v47  ;;  %v4734_v27 = vpop.f32.mrb[78].mxu0 }
 0x216   : > { %v3299_v31 = vadd.f32 %v4734_v27, %v6849_v39  ;;  %v3293_v38 = vpop.f32.mrb[79].mxu0 }
 0x217   : > { %v3294_v55 = vadd.f32 %v3293_v38, %v6852_v44  ;;  %v7033_v44 = vpop.f32.mrb[124].mxu1 }
 0x218   : > { %3621 = vst [vmem:[%s6653_s19 + $0x278] sm:$0xff] %v3299_v31  ;;  %v7036_v17 = vpop.f32.mrb[125].mxu1 }
 0x219   : > { %3620 = vst [vmem:[%s6653_s19 + $0x270] sm:$0xff] %v3294_v55  ;;  %v4737_v24 = vpop.f32.mrb[80].mxu0 }
 0x21a   : > { %v3309_v62 = vadd.f32 %v4737_v24, %v6857_v41  ;;  %v3303_v34 = vpop.f32.mrb[81].mxu0 }
 0x21b   : > { %v3304_v46 = vadd.f32 %v3303_v34, %v6860_v57  ;;  %v7041_v57 = vpop.f32.mrb[126].mxu1 }
 0x21c   : > { %3623 = vst [vmem:[%s6653_s19 + $0x288] sm:$0xff] %v3309_v62  ;;  %v7044_v37 = vpop.f32.mrb[127].mxu1 }
 0x21d   : > { %3622 = vst [vmem:[%s6653_s19 + $0x280] sm:$0xff] %v3304_v46  ;;  %v4740_v39 = vpop.f32.mrb[82].mxu0 }
 0x21e   : > { %v3319_v51 = vadd.f32 %v4740_v39, %v6865_v14  ;;  %v3313_v28 = vpop.f32.mrb[83].mxu0 }
 0x21f   : > { %v3314_v41 = vadd.f32 %v3313_v28, %v6868_v63 }
 0x220   : > { %3625 = vst [vmem:[%s6653_s19 + $0x298] sm:$0xff] %v3319_v51 }
 0x221   : > { %3624 = vst [vmem:[%s6653_s19 + $0x290] sm:$0xff] %v3314_v41  ;;  %v4743_v9 = vpop.f32.mrb[84].mxu0 }
 0x222   : > { %v3329_v7 = vadd.f32 %v4743_v9, %v6873_v48  ;;  %v3323_v16 = vpop.f32.mrb[85].mxu0 }
 0x223   : > { %v3324_v14 = vadd.f32 %v3323_v16, %v6876_v21 }
 0x224   : > { %3627 = vst [vmem:[%s6653_s19 + $0x2a8] sm:$0xff] %v3329_v7 }
 0x225   : > { %3626 = vst [vmem:[%s6653_s19 + $0x2a0] sm:$0xff] %v3324_v14  ;;  %v4746_v61 = vpop.f32.mrb[86].mxu0 }
 0x226   : > { %v3339_v63 = vadd.f32 %v4746_v61, %v6881_v59  ;;  %v3333_v12 = vpop.f32.mrb[87].mxu0 }
 0x227   : > { %v3334_v47 = vadd.f32 %v3333_v12, %v6884_v40 }
 0x228   : > { %3629 = vst [vmem:[%s6653_s19 + $0x2b8] sm:$0xff] %v3339_v63 }
 0x229   : > { %3628 = vst [vmem:[%s6653_s19 + $0x2b0] sm:$0xff] %v3334_v47  ;;  %v4749_v48 = vpop.f32.mrb[88].mxu0 }
 0x22a   : > { %v3349_v27 = vadd.f32 %v4749_v48, %v6889_v13  ;;  %v3343_v31 = vpop.f32.mrb[89].mxu0 }
 0x22b   : > { %v3344_v21 = vadd.f32 %v3343_v31, %v6892_v1 }
 0x22c   : > { %3631 = vst [vmem:[%s6653_s19 + $0x2c8] sm:$0xff] %v3349_v27 }
 0x22d   : > { %3630 = vst [vmem:[%s6653_s19 + $0x2c0] sm:$0xff] %v3344_v21  ;;  %v4752_v38 = vpop.f32.mrb[90].mxu0 }
 0x22e   : > { %v3359_v59 = vadd.f32 %v4752_v38, %v6897_v32  ;;  %v3353_v55 = vpop.f32.mrb[91].mxu0 }
 0x22f   : > { %v3354_v40 = vadd.f32 %v3353_v55, %v6900_v45 }
 0x230   : > { %3633 = vst [vmem:[%s6653_s19 + $0x2d8] sm:$0xff] %v3359_v59 }
 0x231   : > { %3632 = vst [vmem:[%s6653_s19 + $0x2d0] sm:$0xff] %v3354_v40  ;;  %v4755_v24 = vpop.f32.mrb[92].mxu0 }
 0x232   : > { %v3369_v13 = vadd.f32 %v4755_v24, %v6905_v35  ;;  %v3363_v62 = vpop.f32.mrb[93].mxu0 }
 0x233   : > { %v3364_v1 = vadd.f32 %v3363_v62, %v6908_v36 }
 0x234   : > { %3635 = vst [vmem:[%s6653_s19 + $0x2e8] sm:$0xff] %v3369_v13 }
 0x235   : > { %3634 = vst [vmem:[%s6653_s19 + $0x2e0] sm:$0xff] %v3364_v1  ;;  %v4758_v34 = vpop.f32.mrb[94].mxu0 }
 0x236   : > { %v3379_v32 = vadd.f32 %v4758_v34, %v6913_v20  ;;  %v3373_v46 = vpop.f32.mrb[95].mxu0 }
 0x237   : > { %v3374_v45 = vadd.f32 %v3373_v46, %v6916_v4 }
 0x238   : > { %3637 = vst [vmem:[%s6653_s19 + $0x2f8] sm:$0xff] %v3379_v32 }
 0x239   : > { %3636 = vst [vmem:[%s6653_s19 + $0x2f0] sm:$0xff] %v3374_v45  ;;  %v4761_v39 = vpop.f32.mrb[96].mxu0 }
 0x23a   : > { %v3389_v35 = vadd.f32 %v4761_v39, %v6921_v43  ;;  %v3383_v51 = vpop.f32.mrb[97].mxu0 }
 0x23b   : > { %v3384_v36 = vadd.f32 %v3383_v51, %v6924_v58 }
 0x23c   : > { %3639 = vst [vmem:[%s6653_s19 + $0x308] sm:$0xff] %v3389_v35 }
 0x23d   : > { %3638 = vst [vmem:[%s6653_s19 + $0x300] sm:$0xff] %v3384_v36  ;;  %v4764_v28 = vpop.f32.mrb[98].mxu0 }
 0x23e   : > { %v3399_v20 = vadd.f32 %v4764_v28, %v6929_v49  ;;  %v3393_v41 = vpop.f32.mrb[99].mxu0 }
 0x23f   : > { %v3394_v4 = vadd.f32 %v3393_v41, %v6932_v56 }
 0x240   : > { %3641 = vst [vmem:[%s6653_s19 + $0x318] sm:$0xff] %v3399_v20 }
 0x241   : > { %3640 = vst [vmem:[%s6653_s19 + $0x310] sm:$0xff] %v3394_v4  ;;  %v4767_v9 = vpop.f32.mrb[100].mxu0 }
 0x242   : > { %v3409_v43 = vadd.f32 %v4767_v9, %v6937_v23  ;;  %v3403_v7 = vpop.f32.mrb[101].mxu0 }
 0x243   : > { %v3404_v58 = vadd.f32 %v3403_v7, %v6940_v30 }
 0x244   : > { %3643 = vst [vmem:[%s6653_s19 + $0x328] sm:$0xff] %v3409_v43 }
 0x245   : > { %3642 = vst [vmem:[%s6653_s19 + $0x320] sm:$0xff] %v3404_v58  ;;  %v4770_v16 = vpop.f32.mrb[102].mxu0 }
 0x246   : > { %v3419_v49 = vadd.f32 %v4770_v16, %v6945_v5  ;;  %v3413_v14 = vpop.f32.mrb[103].mxu0 }
 0x247   : > { %v3414_v56 = vadd.f32 %v3413_v14, %v6948_v8 }
 0x248   : > { %3645 = vst [vmem:[%s6653_s19 + $0x338] sm:$0xff] %v3419_v49 }
 0x249   : > { %3644 = vst [vmem:[%s6653_s19 + $0x330] sm:$0xff] %v3414_v56  ;;  %v4773_v61 = vpop.f32.mrb[104].mxu0 }
 0x24a   : > { %v3429_v23 = vadd.f32 %v4773_v61, %v6953_v60  ;;  %v3423_v63 = vpop.f32.mrb[105].mxu0 }
 0x24b   : > { %v3424_v30 = vadd.f32 %v3423_v63, %v6956_v22 }
 0x24c   : > { %3647 = vst [vmem:[%s6653_s19 + $0x348] sm:$0xff] %v3429_v23 }
 0x24d   : > { %3646 = vst [vmem:[%s6653_s19 + $0x340] sm:$0xff] %v3424_v30  ;;  %v4776_v12 = vpop.f32.mrb[106].mxu0 }
 0x24e   : > { %v3439_v5 = vadd.f32 %v4776_v12, %v6961_v33  ;;  %v3433_v47 = vpop.f32.mrb[107].mxu0 }
 0x24f   : > { %v3434_v8 = vadd.f32 %v3433_v47, %v6964_v29 }
 0x250   : > { %3649 = vst [vmem:[%s6653_s19 + $0x358] sm:$0xff] %v3439_v5 }
 0x251   : > { %3648 = vst [vmem:[%s6653_s19 + $0x350] sm:$0xff] %v3434_v8  ;;  %v4779_v48 = vpop.f32.mrb[108].mxu0 }
 0x252   : > { %v3449_v60 = vadd.f32 %v4779_v48, %v6969_v10  ;;  %v3443_v27 = vpop.f32.mrb[109].mxu0 }
 0x253   : > { %v3444_v22 = vadd.f32 %v3443_v27, %v6972_v52 }
 0x254   : > { %3651 = vst [vmem:[%s6653_s19 + $0x368] sm:$0xff] %v3449_v60 }
 0x255   : > { %3650 = vst [vmem:[%s6653_s19 + $0x360] sm:$0xff] %v3444_v22  ;;  %v4782_v31 = vpop.f32.mrb[110].mxu0 }
 0x256   : > { %v3459_v33 = vadd.f32 %v4782_v31, %v6977_v50  ;;  %v3453_v21 = vpop.f32.mrb[111].mxu0 }
 0x257   : > { %v3454_v29 = vadd.f32 %v3453_v21, %v6980_v19 }
 0x258   : > { %3653 = vst [vmem:[%s6653_s19 + $0x378] sm:$0xff] %v3459_v33 }
 0x259   : > { %3652 = vst [vmem:[%s6653_s19 + $0x370] sm:$0xff] %v3454_v29  ;;  %v4785_v38 = vpop.f32.mrb[112].mxu0 }
 0x25a   : > { %v3469_v10 = vadd.f32 %v4785_v38, %v6985_v18  ;;  %v3463_v59 = vpop.f32.mrb[113].mxu0 }
 0x25b   : > { %v3464_v52 = vadd.f32 %v3463_v59, %v6988_v15 }
 0x25c   : > { %3655 = vst [vmem:[%s6653_s19 + $0x388] sm:$0xff] %v3469_v10 }
 0x25d   : > { %3654 = vst [vmem:[%s6653_s19 + $0x380] sm:$0xff] %v3464_v52  ;;  %v4788_v55 = vpop.f32.mrb[114].mxu0 }
 0x25e   : > { %v3479_v50 = vadd.f32 %v4788_v55, %v6993_v26  ;;  %v3473_v40 = vpop.f32.mrb[115].mxu0 }
 0x25f   : > { %v3474_v19 = vadd.f32 %v3473_v40, %v6996_v11 }
 0x260   : > { %3657 = vst [vmem:[%s6653_s19 + $0x398] sm:$0xff] %v3479_v50 }
 0x261   : > { %3656 = vst [vmem:[%s6653_s19 + $0x390] sm:$0xff] %v3474_v19  ;;  %v4791_v24 = vpop.f32.mrb[116].mxu0 }
 0x262   : > { %v3489_v18 = vadd.f32 %v4791_v24, %v7001_v6  ;;  %v3483_v13 = vpop.f32.mrb[117].mxu0 }
 0x263   : > { %v3484_v15 = vadd.f32 %v3483_v13, %v7004_v53 }
 0x264   : > { %3659 = vst [vmem:[%s6653_s19 + $0x3a8] sm:$0xff] %v3489_v18 }
 0x265   : > { %3658 = vst [vmem:[%s6653_s19 + $0x3a0] sm:$0xff] %v3484_v15  ;;  %v4794_v62 = vpop.f32.mrb[118].mxu0 }
 0x266   : > { %v3499_v26 = vadd.f32 %v4794_v62, %v7009_v42  ;;  %v3493_v1 = vpop.f32.mrb[119].mxu0 }
 0x267   : > { %v3494_v11 = vadd.f32 %v3493_v1, %v7012_v3 }
 0x268   : > { %3661 = vst [vmem:[%s6653_s19 + $0x3b8] sm:$0xff] %v3499_v26 }
 0x269   : > { %3660 = vst [vmem:[%s6653_s19 + $0x3b0] sm:$0xff] %v3494_v11  ;;  %v4797_v34 = vpop.f32.mrb[120].mxu0 }
 0x26a   : > { %v3509_v6 = vadd.f32 %v4797_v34, %v7017_v25  ;;  %v3503_v32 = vpop.f32.mrb[121].mxu0 }
 0x26b   : > { %v3504_v53 = vadd.f32 %v3503_v32, %v7020_v2 }
 0x26c   : > { %3663 = vst [vmem:[%s6653_s19 + $0x3c8] sm:$0xff] %v3509_v6 }
 0x26d   : > { %3662 = vst [vmem:[%s6653_s19 + $0x3c0] sm:$0xff] %v3504_v53  ;;  %v4800_v46 = vpop.f32.mrb[122].mxu0 }
 0x26e   : > { %v3519_v42 = vadd.f32 %v4800_v46, %v7025_v54  ;;  %v3513_v45 = vpop.f32.mrb[123].mxu0 }
 0x26f   : > { %v3514_v3 = vadd.f32 %v3513_v45, %v7028_v0 }
 0x270   : > { %3665 = vst [vmem:[%s6653_s19 + $0x3d8] sm:$0xff] %v3519_v42 }
 0x271   : > { %3664 = vst [vmem:[%s6653_s19 + $0x3d0] sm:$0xff] %v3514_v3  ;;  %v4803_v39 = vpop.f32.mrb[124].mxu0 }
 0x272   : > { %v3529_v25 = vadd.f32 %v4803_v39, %v7033_v44  ;;  %v3523_v35 = vpop.f32.mrb[125].mxu0 }
 0x273   : > { %v3524_v51 = vadd.f32 %v3523_v35, %v7036_v17  ;;  %3677 = sbr.rel (!%p5376_p5) target bundleno = 662 (0x296), region = 36 }
 0x274   : > { %3667 = vst [vmem:[%s6653_s19 + $0x3e8] sm:$0xff] %v3529_v25 }
 0x275   : > { %3666 = vst [vmem:[%s6653_s19 + $0x3e0] sm:$0xff] %v3524_v51  ;;  %v4806_v2 = vpop.f32.mrb[126].mxu0 }
 0x276   : > { %v3539_v36 = vadd.f32 %v4806_v2, %v7041_v57  ;;  %v3533_v28 = vpop.f32.mrb[127].mxu0 }
 0x277   : > { %v3534_v54 = vadd.f32 %v3533_v28, %v7044_v37 }
 0x278   : > { %3669 = vst [vmem:[%s6653_s19 + $0x3f8] sm:$0xff] %v3539_v36 }
 0x279   : > { %3668 = vst [vmem:[%s6653_s19 + $0x3f0] sm:$0xff] %v3534_v54 }
 0x27a   : > { %s7207_s25 = smov (!%p3680_p11, %s3679_s25), 128 }
 0x27b   : > { %s7140_s26 = sshll.u32 %s7207_s25, 7 }
 0x27c   : > { %s3684_s27 = ssub.s32 16384, %s7140_s26 }
 0x27d   : > { %3685 = vsyncadd %s7135_s20, %s3684_s27  ;;  %p4148_p12 = scmp.ne.s32.totalorder %s7140_s26, 0  ;;  %s4154_s28 = sshll.u32 %s5359_s16, 14 }
 0x27e   : > { %s7149_s30 = scalar_lea.hbm %s7199_s3, %s4154_s28  ;;  %s3690_s24 = sshll.u32 %s6653_s19, 4  ;;  %s7152_s24 = int_to_ptr.vmem [resolvable:$true] %s3690_s24 }
 0x27f   : > { %s5248_s4 = scalar_lea.vmem %s7152_s24, %s7140_s26  ;;  %s5315_s5 = smov [#allocation2]  }
 0x280   : > { %p5249_p13 = scmp.ne.s32.totalorder %s7152_s24, %s5248_s4  ;;  %s5252_s6 = sshll.u32 %s5315_s5, 4  ;;  %s5253_s6 = int_to_ptr.vmem [resolvable:$false] %s5252_s6 }
 0x281   : > { %s5254_s16 = scalar_lea.vmem %s5253_s6, 32768  ;;  %p5255_p2 = scmp.lt.s32.totalorder %s7152_s24, %s5253_s6 }
 0x282   : > { %p5250_p0 = pnand %p5249_p13, %p4148_p12  ;;  %p5256_p3 = scmp.lt.s32.totalorder %s5254_s16, %s5248_s4 }
 0x284   : > { %p5251_p1 = pneg %p5250_p0  ;;  %p5257_p4 = por %p5256_p3, %p5255_p2 }
 0x286   : > { %p5258_p5 = pnand %p5257_p4, %p5251_p1 }
 0x288   : > { %5261 = shalt.err (!%p5258_p5)
}
 0x289   : > { %s5262_s7 = scalar_lea.hbm %s7149_s30, %s7140_s26  ;;  %s5266_s10 = scalar_lea.hbm %s7199_s3, 48000 }
 0x28a   : > { %p5263_p7 = scmp.ne.s32.totalorder %s7149_s30, %s5262_s7  ;;  %p5267_p10 = scmp.lt.u32.totalorder %s7149_s30, %s7199_s3 }
 0x28b   : > { %p5268_p11 = scmp.lt.u32.totalorder %s5266_s10, %s5262_s7  ;;  %p5270_p0 = scmp.lt.u32.totalorder %s5262_s7, %s7149_s30 }
 0x28c   : > { %p5264_p8 = pnand %p5263_p7, %p4148_p12 }
 0x28d   : > { %p5269_p13 = por %p5268_p11, %p5267_p10 }
 0x28e   : > { %p5265_p9 = pneg %p5264_p8 }
 0x28f   : > { %p5271_p1 = por %p5270_p0, %p5269_p13 }
 0x291   : > { %p5272_p2 = pnand %p5271_p1, %p5265_p9 }
 0x293   : > { %5275 = shalt.err (!%p5272_p2)
}
 0x294   : > { %s5316_s19 = smov 128   ;;  %s5317_s25 = smov 8  }
 0x295   : > { %3696 = dma.vmem_to_hbm [thread:$0]  (%p4148_p12), %s7152_s24, %s7140_s26, %s7149_s30, %s7135_s20, %s5316_s19, %s5316_s19, %s5317_s25  }
 0x296 PF: > { %p5208_p3 = scmp.ge.s32.totalorder %s5310_s15, 2  ;;  %s3705_s27 = sand.u32 1, %s5298_s12  }
 0x297   : > { %s3706_s28 = scalar_lea.sflag [#allocation3], %s3705_s27 }
 0x298   : > { %p5205_p4 = pnand %p5208_p3, %p5380_p6 }
 0x29a   : > { %5293 = dma.done.wait (!%p5205_p4), %s3706_s28, 16384  }
 0x29b   : > { %5295 = vsyncadd (!%p5205_p4), %s3706_s28, 4294950912  ;;  %p13_p5 = scmp.ge.s32.totalorder %s5363_s18, 5   ;;  %s7202_s12 = smov %s5302_s13 }
 0x29c   : > { %s7203_s13 = smov %s5306_s14  ;;  %s7204_s14 = smov %s5374_s21 }
 0x29d   : > { %s7205_s15 = smov %s5363_s18  ;;  %15 = sbr.rel (!%p13_p5) target bundleno = 3 (0x3), region = 67 }
 0x2a4   :  { %3711 = vsyncpa [#allocation3], 1 }
 0x2a5   :  { %3713 = vsyncpa [#allocation3 + $0x1], 1 }

</bundles_post_ra>
